<compile_context>
chip_gen: v7x
topology: tpu7x:2x2x1
jax: 0.10.0
libtpu: 0.0.40
codegen_flags: <defaults>
</compile_context>

<pallas_src>
import functools
import jax
import jax.numpy as jnp
from jax import lax
from jax.experimental import pallas as pl
from jax.experimental.pallas import tpu as pltpu


def _round_up(x, m):
    return ((x + m - 1) // m) * m


# --------------------------- fused decoder kernel ---------------------------
def decoder_kernel(dec_ref, wcat_ref, b_lstm_ref, enc_ref, w_rnn_ref, b_rnn_ref,
                   w_fa_ref, w_fb_ref, b_fin_ref, out_ref, hs_sc):
    """Whole LSTM_Decoder forward in one kernel body (single grid step).

    dec_ref:   (L, N, I)        sequence-first LSTM input
    wcat_ref:  (I+H, 4H)        concat([W_ih^T, W_hh^T])
    b_lstm_ref:(1, 4H)          b_ih + b_hh
    enc_ref:   (L, Kp)          encoder output, K=1000 zero-padded to Kp=1024
    w_rnn_ref: (N, H, Kp)       rnn_fc weight^T, reshaped per feature block
    b_rnn_ref: (1, Kp)
    w_fa_ref:  (Kp, Cp)         final_layer weight^T, enc half, padded
    w_fb_ref:  (Kp, Cp)         final_layer weight^T, rnn_fc half, padded
    b_fin_ref: (1, Cp)
    out_ref:   (L, Cp)          lane-dense (Cp = 128-multiple) output slab
    hs_sc:     (L, N, H)        VMEM scratch holding all per-step hidden states
    """
    L, N, I = dec_ref.shape
    H = wcat_ref.shape[0] - I

    # Hoist loop-invariant loads / broadcasts out of the unrolled time loop
    # (JAX does not CSE broadcast_in_dim; an in-loop broadcast re-emits per iteration).
    w_cat = wcat_ref[...]                                     # (I+H, 4H)
    b_gates = jnp.broadcast_to(b_lstm_ref[...], (N, 4 * H))   # (N, 4H)

    def step(t, carry):
        h, c = carry                                          # (N, H) each
        x = dec_ref[t]                                        # (N, I)
        xh = jnp.concatenate([x, h], axis=1)                  # (N, I+H) -> single MXU pass
        gates = jnp.dot(xh, w_cat, preferred_element_type=jnp.float32) + b_gates
        i_g = jax.nn.sigmoid(gates[:, 0 * H:1 * H])
        f_g = jax.nn.sigmoid(gates[:, 1 * H:2 * H])
        g_g = jnp.tanh(gates[:, 2 * H:3 * H])
        o_g = jax.nn.sigmoid(gates[:, 3 * H:4 * H])
        c_new = f_g * c + i_g * g_g
        h_new = o_g * jnp.tanh(c_new)
        hs_sc[t] = h_new                                      # VMEM-resident, no HBM writeback
        return (h_new, c_new)

    zeros = jnp.zeros((N, H), jnp.float32)
    lax.fori_loop(0, L, step, (zeros, zeros), unroll=True)

    # rnn_fc:  hid = h_flat @ W_rnn^T + b_rnn, with h_flat row t = [h_t[0,:], ..., h_t[N-1,:]].
    # Computed as a sum of per-feature blocks to avoid a lane-crossing (L,N,H)->(L,N*H) reshape.
    hs = hs_sc[...]                                           # (L, N, H)
    Kp = b_rnn_ref.shape[1]
    acc = jnp.zeros((L, Kp), jnp.float32)
    for n in range(N):                                        # N is tiny & static
        acc = acc + jnp.dot(hs[:, n, :], w_rnn_ref[n],
                            preferred_element_type=jnp.float32)
    hid = acc + b_rnn_ref[...]                                # (L, Kp)

    # final_layer on cat([enc_out, hid]) == enc @ Wfa + hid @ Wfb + b  (lane-dense Cp output).
    out = (jnp.dot(enc_ref[...], w_fa_ref[...], preferred_element_type=jnp.float32)
           + jnp.dot(hid, w_fb_ref[...], preferred_element_type=jnp.float32)
           + b_fin_ref[...])
    # TODO(synk): dropout is identity at inference (eval mode); training-mode dropout not implemented.
    out_ref[...] = out


# ------------------------------- wrapper ------------------------------------
@functools.partial(jax.jit, static_argnames=("class_n",))
def lstm_decoder_forward(enc_out, dec_inp, params, *, class_n):
    L, N, I = dec_inp.shape
    w_cat = params["w_cat"]
    H = w_cat.shape[0] - I
    w_rnn3 = params["w_rnn3"]
    # Inherited from the PyTorch .view: num_features * embedding_dim == rnn_fc in_features.
    assert N * H == w_rnn3.shape[0] * w_rnn3.shape[1], (
        "num_features * embedding_dim must equal rnn_fc in_features")

    Kp = params["b_rnn"].shape[1]
    Cp = params["b_fin"].shape[1]
    K = enc_out.shape[1]
    enc_p = jnp.pad(enc_out, ((0, 0), (0, Kp - K)))           # lane-pad 1000 -> 1024

    def full(a):
        return pl.BlockSpec(a.shape, lambda: (0,) * a.ndim)

    out_p = pl.pallas_call(
        decoder_kernel,
        out_shape=jax.ShapeDtypeStruct((L, Cp), jnp.float32),
        in_specs=[
            full(dec_inp),
            full(w_cat),
            full(params["b_lstm"]),
            full(enc_p),
            full(w_rnn3),
            full(params["b_rnn"]),
            full(params["w_fa"]),
            full(params["w_fb"]),
            full(params["b_fin"]),
        ],
        out_specs=pl.BlockSpec((L, Cp), lambda: (0, 0)),
        scratch_shapes=[pltpu.VMEM((L, N, H), jnp.float32)],
    )(dec_inp, w_cat, params["b_lstm"], enc_p, w_rnn3, params["b_rnn"],
      params["w_fa"], params["w_fb"], params["b_fin"])

    return out_p[:, :class_n]


def prepare_params(w_ih, w_hh, b_ih, b_hh, w_rnn, b_rnn, w_fin, b_fin,
                   num_features, embedding_dim):
    """Pre-transpose / concatenate / zero-pad PyTorch-layout weights for the kernel."""
    H = embedding_dim
    N = num_features
    K = w_rnn.shape[0]                 # 1000 (rnn_fc out features == half of final in)
    Kp = _round_up(K, 128)             # 1024
    class_n = w_fin.shape[0]
    Cp = _round_up(class_n, 128)       # 128

    w_cat = jnp.concatenate([w_ih.T, w_hh.T], axis=0)         # (I+H, 4H)
    b_lstm = (b_ih + b_hh).reshape(1, -1)                     # (1, 4H)

    w_rnn_t = jnp.pad(w_rnn.T, ((0, 0), (0, Kp - K)))         # (N*H, Kp)
    w_rnn3 = w_rnn_t.reshape(N, H, Kp)                        # (N, H, Kp)
    b_rnn_p = jnp.pad(b_rnn, (0, Kp - K)).reshape(1, Kp)      # (1, Kp)

    w_fa = jnp.pad(w_fin[:, :K].T, ((0, Kp - K), (0, Cp - class_n)))   # (Kp, Cp)
    w_fb = jnp.pad(w_fin[:, K:].T, ((0, Kp - K), (0, Cp - class_n)))   # (Kp, Cp)
    b_fin_p = jnp.pad(b_fin, (0, Cp - class_n)).reshape(1, Cp)         # (1, Cp)

    return {
        "w_cat": w_cat, "b_lstm": b_lstm,
        "w_rnn3": w_rnn3, "b_rnn": b_rnn_p,
        "w_fa": w_fa, "w_fb": w_fb, "b_fin": b_fin_p,
    }


# --------------------------- pure-JAX reference -----------------------------
def reference_forward(enc_out, dec_inp, raw):
    L, N, _ = dec_inp.shape
    H = raw["w_hh"].shape[1]
    w_ih_t, w_hh_t = raw["w_ih"].T, raw["w_hh"].T
    b = (raw["b_ih"] + raw["b_hh"]).reshape(1, -1)

    def step(carry, x_t):
        h, c = carry
        gates = x_t @ w_ih_t + h @ w_hh_t + b
        i_g = jax.nn.sigmoid(gates[:, 0 * H:1 * H])
        f_g = jax.nn.sigmoid(gates[:, 1 * H:2 * H])
        g_g = jnp.tanh(gates[:, 2 * H:3 * H])
        o_g = jax.nn.sigmoid(gates[:, 3 * H:4 * H])
        c_new = f_g * c + i_g * g_g
        h_new = o_g * jnp.tanh(c_new)
        return (h_new, c_new), h_new

    init = (jnp.zeros((N, H), jnp.float32), jnp.zeros((N, H), jnp.float32))
    _, hs = jax.lax.scan(step, init, dec_inp)                 # (L, N, H)
    h_flat = hs.reshape(L, -1)
    hid = h_flat @ raw["w_rnn"].T + raw["b_rnn"]
    concat = jnp.concatenate([enc_out, hid], axis=1)
    return concat @ raw["w_fin"].T + raw["b_fin"]


if __name__ == "__main__":
    # Module hyperparameters (small, self-consistent shapes).
    max_len = 16        # LSTM input_size I
    embedding_dim = 32  # LSTM hidden_size H
    num_features = 4    # N (the LSTM "batch" dim); N*H must equal rnn_fc in_features
    class_n = 8
    L = 8               # sequence length == batch dim of enc_out / output
    rate = 0.1          # dropout rate (identity at inference)

    key = jax.random.PRNGKey(0)
    ks = jax.random.split(key, 10)
    scale = 0.1

    # PyTorch-layout params.
    w_ih = scale * jax.random.normal(ks[0], (4 * embedding_dim, max_len), jnp.float32)
    w_hh = scale * jax.random.normal(ks[1], (4 * embedding_dim, embedding_dim), jnp.float32)
    b_ih = scale * jax.random.normal(ks[2], (4 * embedding_dim,), jnp.float32)
    b_hh = scale * jax.random.normal(ks[3], (4 * embedding_dim,), jnp.float32)
    w_rnn = scale * jax.random.normal(ks[4], (1000, num_features * embedding_dim), jnp.float32)
    b_rnn = scale * jax.random.normal(ks[5], (1000,), jnp.float32)
    w_fin = scale * jax.random.normal(ks[6], (class_n, 2000), jnp.float32)
    b_fin = scale * jax.random.normal(ks[7], (class_n,), jnp.float32)

    raw = {"w_ih": w_ih, "w_hh": w_hh, "b_ih": b_ih, "b_hh": b_hh,
           "w_rnn": w_rnn, "b_rnn": b_rnn, "w_fin": w_fin, "b_fin": b_fin}
    params = prepare_params(w_ih, w_hh, b_ih, b_hh, w_rnn, b_rnn, w_fin, b_fin,
                            num_features, embedding_dim)

    enc_out = jax.random.normal(ks[8], (L, 1000), jnp.float32)
    dec_inp = jax.random.normal(ks[9], (L, num_features, max_len), jnp.float32)

    out = lstm_decoder_forward(enc_out, dec_inp, params, class_n=class_n)
    out = jax.block_until_ready(out)
    assert out.shape == (L, class_n), out.shape

    ref = reference_forward(enc_out, dec_inp, raw)
    assert jnp.allclose(out, ref, rtol=1e-2, atol=1e-2), (
        "mismatch vs reference", float(jnp.max(jnp.abs(out - ref))))

    print("KERNEL_OK")
</pallas_src>

<mosaic_0001>
module attributes {stable_mosaic.version = 11 : i64} {
  func.func @decoder_kernel(%arg0: memref<8x4x16xf32, #tpu.memory_space<vmem>>, %arg1: memref<48x128xf32, #tpu.memory_space<vmem>>, %arg2: memref<1x128xf32, #tpu.memory_space<vmem>>, %arg3: memref<8x1024xf32, #tpu.memory_space<vmem>>, %arg4: memref<4x32x1024xf32, #tpu.memory_space<vmem>>, %arg5: memref<1x1024xf32, #tpu.memory_space<vmem>>, %arg6: memref<1024x128xf32, #tpu.memory_space<vmem>>, %arg7: memref<1024x128xf32, #tpu.memory_space<vmem>>, %arg8: memref<1x128xf32, #tpu.memory_space<vmem>>, %arg9: memref<8x128xf32, #tpu.memory_space<vmem>>, %arg10: memref<8x4x32xf32, #tpu.memory_space<vmem>>) attributes {dimension_semantics = [], scalar_prefetch = 0 : i64, scratch_operands = 1 : i64, tpu.core_type = #tpu.core_type<tc>} {
    %c0 = arith.constant 0 : index
    %c0_0 = arith.constant 0 : index
    %0 = vector.load %arg1[%c0, %c0_0] : memref<48x128xf32, #tpu.memory_space<vmem>>, vector<48x128xf32>
    %c0_1 = arith.constant 0 : index
    %c0_2 = arith.constant 0 : index
    %1 = vector.load %arg2[%c0_1, %c0_2] : memref<1x128xf32, #tpu.memory_space<vmem>>, vector<1x128xf32>
    %2 = vector.shape_cast %1 : vector<1x128xf32> to vector<1x128xf32>
    %3 = vector.broadcast %2 : vector<1x128xf32> to vector<4x128xf32>
    %cst = arith.constant 0.000000e+00 : f32
    %4 = vector.broadcast %cst : f32 to vector<4x32xf32>
    %c0_i32 = arith.constant 0 : i32
    %5 = arith.index_cast %c0_i32 : i32 to index
    %c0_3 = arith.constant 0 : index
    %c0_4 = arith.constant 0 : index
    %6 = vector.load %arg0[%5, %c0_3, %c0_4] : memref<8x4x16xf32, #tpu.memory_space<vmem>>, vector<1x4x16xf32>
    %7 = vector.shape_cast %6 : vector<1x4x16xf32> to vector<4x16xf32>
    %8 = tpu.concatenate %7, %4 in 1 : vector<4x16xf32>, vector<4x32xf32> -> vector<4x48xf32>
    %cst_5 = arith.constant dense<0.000000e+00> : vector<4x128xf32>
    %9 = tpu.matmul %8, %0, %cst_5 {dimension_numbers = #tpu.dot_dimension_numbers<[1], [0], [0], [1], [0, 0, 1, 1], [], []>} : vector<4x48xf32>, vector<48x128xf32>, vector<4x128xf32> -> vector<4x128xf32>
    %10 = arith.addf %9, %3 : vector<4x128xf32>
    %11 = vector.extract_strided_slice %10 {offsets = [0, 0], sizes = [4, 32], strides = [1, 1]} : vector<4x128xf32> to vector<4x32xf32>
    %12 = arith.negf %11 : vector<4x32xf32>
    %13 = math.exp %12 : vector<4x32xf32>
    %cst_6 = arith.constant 1.000000e+00 : f32
    %14 = vector.broadcast %cst_6 : f32 to vector<4x32xf32>
    %15 = arith.addf %14, %13 : vector<4x32xf32>
    %16 = arith.divf %14, %15 : vector<4x32xf32>
    %17 = vector.extract_strided_slice %10 {offsets = [0, 32], sizes = [4, 32], strides = [1, 1]} : vector<4x128xf32> to vector<4x32xf32>
    %18 = arith.negf %17 : vector<4x32xf32>
    %19 = math.exp %18 : vector<4x32xf32>
    %cst_7 = arith.constant 1.000000e+00 : f32
    %20 = vector.broadcast %cst_7 : f32 to vector<4x32xf32>
    %21 = arith.addf %20, %19 : vector<4x32xf32>
    %22 = arith.divf %20, %21 : vector<4x32xf32>
    %23 = vector.extract_strided_slice %10 {offsets = [0, 64], sizes = [4, 32], strides = [1, 1]} : vector<4x128xf32> to vector<4x32xf32>
    %24 = math.tanh %23 : vector<4x32xf32>
    %25 = vector.extract_strided_slice %10 {offsets = [0, 96], sizes = [4, 32], strides = [1, 1]} : vector<4x128xf32> to vector<4x32xf32>
    %26 = arith.negf %25 : vector<4x32xf32>
    %27 = math.exp %26 : vector<4x32xf32>
    %cst_8 = arith.constant 1.000000e+00 : f32
    %28 = vector.broadcast %cst_8 : f32 to vector<4x32xf32>
    %29 = arith.addf %28, %27 : vector<4x32xf32>
    %30 = arith.divf %28, %29 : vector<4x32xf32>
    %31 = arith.mulf %22, %4 : vector<4x32xf32>
    %32 = arith.mulf %16, %24 : vector<4x32xf32>
    %33 = arith.addf %31, %32 : vector<4x32xf32>
    %34 = math.tanh %33 : vector<4x32xf32>
    %35 = arith.mulf %30, %34 : vector<4x32xf32>
    %36 = arith.index_cast %c0_i32 : i32 to index
    %c0_9 = arith.constant 0 : index
    %c0_10 = arith.constant 0 : index
    %37 = vector.load %arg10[%36, %c0_9, %c0_10] : memref<8x4x32xf32, #tpu.memory_space<vmem>>, vector<1x4x32xf32>
    %38 = vector.shape_cast %37 : vector<1x4x32xf32> to vector<4x32xf32>
    %39 = vector.shape_cast %35 : vector<4x32xf32> to vector<1x4x32xf32>
    tpu.vector_store %arg10[%36, %c0_9, %c0_10], %39 {strides = array<i32>} : memref<8x4x32xf32, #tpu.memory_space<vmem>>, vector<1x4x32xf32>,
    %c1_i32 = arith.constant 1 : i32
    %40 = arith.index_cast %c1_i32 : i32 to index
    %c0_11 = arith.constant 0 : index
    %c0_12 = arith.constant 0 : index
    %41 = vector.load %arg0[%40, %c0_11, %c0_12] : memref<8x4x16xf32, #tpu.memory_space<vmem>>, vector<1x4x16xf32>
    %42 = vector.shape_cast %41 : vector<1x4x16xf32> to vector<4x16xf32>
    %43 = tpu.concatenate %42, %35 in 1 : vector<4x16xf32>, vector<4x32xf32> -> vector<4x48xf32>
    %cst_13 = arith.constant dense<0.000000e+00> : vector<4x128xf32>
    %44 = tpu.matmul %43, %0, %cst_13 {dimension_numbers = #tpu.dot_dimension_numbers<[1], [0], [0], [1], [0, 0, 1, 1], [], []>} : vector<4x48xf32>, vector<48x128xf32>, vector<4x128xf32> -> vector<4x128xf32>
    %45 = arith.addf %44, %3 : vector<4x128xf32>
    %46 = vector.extract_strided_slice %45 {offsets = [0, 0], sizes = [4, 32], strides = [1, 1]} : vector<4x128xf32> to vector<4x32xf32>
    %47 = arith.negf %46 : vector<4x32xf32>
    %48 = math.exp %47 : vector<4x32xf32>
    %cst_14 = arith.constant 1.000000e+00 : f32
    %49 = vector.broadcast %cst_14 : f32 to vector<4x32xf32>
    %50 = arith.addf %49, %48 : vector<4x32xf32>
    %51 = arith.divf %49, %50 : vector<4x32xf32>
    %52 = vector.extract_strided_slice %45 {offsets = [0, 32], sizes = [4, 32], strides = [1, 1]} : vector<4x128xf32> to vector<4x32xf32>
    %53 = arith.negf %52 : vector<4x32xf32>
    %54 = math.exp %53 : vector<4x32xf32>
    %cst_15 = arith.constant 1.000000e+00 : f32
    %55 = vector.broadcast %cst_15 : f32 to vector<4x32xf32>
    %56 = arith.addf %55, %54 : vector<4x32xf32>
    %57 = arith.divf %55, %56 : vector<4x32xf32>
    %58 = vector.extract_strided_slice %45 {offsets = [0, 64], sizes = [4, 32], strides = [1, 1]} : vector<4x128xf32> to vector<4x32xf32>
    %59 = math.tanh %58 : vector<4x32xf32>
    %60 = vector.extract_strided_slice %45 {offsets = [0, 96], sizes = [4, 32], strides = [1, 1]} : vector<4x128xf32> to vector<4x32xf32>
    %61 = arith.negf %60 : vector<4x32xf32>
    %62 = math.exp %61 : vector<4x32xf32>
    %cst_16 = arith.constant 1.000000e+00 : f32
    %63 = vector.broadcast %cst_16 : f32 to vector<4x32xf32>
    %64 = arith.addf %63, %62 : vector<4x32xf32>
    %65 = arith.divf %63, %64 : vector<4x32xf32>
    %66 = arith.mulf %57, %33 : vector<4x32xf32>
    %67 = arith.mulf %51, %59 : vector<4x32xf32>
    %68 = arith.addf %66, %67 : vector<4x32xf32>
    %69 = math.tanh %68 : vector<4x32xf32>
    %70 = arith.mulf %65, %69 : vector<4x32xf32>
    %71 = arith.index_cast %c1_i32 : i32 to index
    %c0_17 = arith.constant 0 : index
    %c0_18 = arith.constant 0 : index
    %72 = vector.load %arg10[%71, %c0_17, %c0_18] : memref<8x4x32xf32, #tpu.memory_space<vmem>>, vector<1x4x32xf32>
    %73 = vector.shape_cast %72 : vector<1x4x32xf32> to vector<4x32xf32>
    %74 = vector.shape_cast %70 : vector<4x32xf32> to vector<1x4x32xf32>
    tpu.vector_store %arg10[%71, %c0_17, %c0_18], %74 {strides = array<i32>} : memref<8x4x32xf32, #tpu.memory_space<vmem>>, vector<1x4x32xf32>,
    %c2_i32 = arith.constant 2 : i32
    %75 = arith.index_cast %c2_i32 : i32 to index
    %c0_19 = arith.constant 0 : index
    %c0_20 = arith.constant 0 : index
    %76 = vector.load %arg0[%75, %c0_19, %c0_20] : memref<8x4x16xf32, #tpu.memory_space<vmem>>, vector<1x4x16xf32>
    %77 = vector.shape_cast %76 : vector<1x4x16xf32> to vector<4x16xf32>
    %78 = tpu.concatenate %77, %70 in 1 : vector<4x16xf32>, vector<4x32xf32> -> vector<4x48xf32>
    %cst_21 = arith.constant dense<0.000000e+00> : vector<4x128xf32>
    %79 = tpu.matmul %78, %0, %cst_21 {dimension_numbers = #tpu.dot_dimension_numbers<[1], [0], [0], [1], [0, 0, 1, 1], [], []>} : vector<4x48xf32>, vector<48x128xf32>, vector<4x128xf32> -> vector<4x128xf32>
    %80 = arith.addf %79, %3 : vector<4x128xf32>
    %81 = vector.extract_strided_slice %80 {offsets = [0, 0], sizes = [4, 32], strides = [1, 1]} : vector<4x128xf32> to vector<4x32xf32>
    %82 = arith.negf %81 : vector<4x32xf32>
    %83 = math.exp %82 : vector<4x32xf32>
    %cst_22 = arith.constant 1.000000e+00 : f32
    %84 = vector.broadcast %cst_22 : f32 to vector<4x32xf32>
    %85 = arith.addf %84, %83 : vector<4x32xf32>
    %86 = arith.divf %84, %85 : vector<4x32xf32>
    %87 = vector.extract_strided_slice %80 {offsets = [0, 32], sizes = [4, 32], strides = [1, 1]} : vector<4x128xf32> to vector<4x32xf32>
    %88 = arith.negf %87 : vector<4x32xf32>
    %89 = math.exp %88 : vector<4x32xf32>
    %cst_23 = arith.constant 1.000000e+00 : f32
    %90 = vector.broadcast %cst_23 : f32 to vector<4x32xf32>
    %91 = arith.addf %90, %89 : vector<4x32xf32>
    %92 = arith.divf %90, %91 : vector<4x32xf32>
    %93 = vector.extract_strided_slice %80 {offsets = [0, 64], sizes = [4, 32], strides = [1, 1]} : vector<4x128xf32> to vector<4x32xf32>
    %94 = math.tanh %93 : vector<4x32xf32>
    %95 = vector.extract_strided_slice %80 {offsets = [0, 96], sizes = [4, 32], strides = [1, 1]} : vector<4x128xf32> to vector<4x32xf32>
    %96 = arith.negf %95 : vector<4x32xf32>
    %97 = math.exp %96 : vector<4x32xf32>
    %cst_24 = arith.constant 1.000000e+00 : f32
    %98 = vector.broadcast %cst_24 : f32 to vector<4x32xf32>
    %99 = arith.addf %98, %97 : vector<4x32xf32>
    %100 = arith.divf %98, %99 : vector<4x32xf32>
    %101 = arith.mulf %92, %68 : vector<4x32xf32>
    %102 = arith.mulf %86, %94 : vector<4x32xf32>
    %103 = arith.addf %101, %102 : vector<4x32xf32>
    %104 = math.tanh %103 : vector<4x32xf32>
    %105 = arith.mulf %100, %104 : vector<4x32xf32>
    %106 = arith.index_cast %c2_i32 : i32 to index
    %c0_25 = arith.constant 0 : index
    %c0_26 = arith.constant 0 : index
    %107 = vector.load %arg10[%106, %c0_25, %c0_26] : memref<8x4x32xf32, #tpu.memory_space<vmem>>, vector<1x4x32xf32>
    %108 = vector.shape_cast %107 : vector<1x4x32xf32> to vector<4x32xf32>
    %109 = vector.shape_cast %105 : vector<4x32xf32> to vector<1x4x32xf32>
    tpu.vector_store %arg10[%106, %c0_25, %c0_26], %109 {strides = array<i32>} : memref<8x4x32xf32, #tpu.memory_space<vmem>>, vector<1x4x32xf32>,
    %c3_i32 = arith.constant 3 : i32
    %110 = arith.index_cast %c3_i32 : i32 to index
    %c0_27 = arith.constant 0 : index
    %c0_28 = arith.constant 0 : index
    %111 = vector.load %arg0[%110, %c0_27, %c0_28] : memref<8x4x16xf32, #tpu.memory_space<vmem>>, vector<1x4x16xf32>
    %112 = vector.shape_cast %111 : vector<1x4x16xf32> to vector<4x16xf32>
    %113 = tpu.concatenate %112, %105 in 1 : vector<4x16xf32>, vector<4x32xf32> -> vector<4x48xf32>
    %cst_29 = arith.constant dense<0.000000e+00> : vector<4x128xf32>
    %114 = tpu.matmul %113, %0, %cst_29 {dimension_numbers = #tpu.dot_dimension_numbers<[1], [0], [0], [1], [0, 0, 1, 1], [], []>} : vector<4x48xf32>, vector<48x128xf32>, vector<4x128xf32> -> vector<4x128xf32>
    %115 = arith.addf %114, %3 : vector<4x128xf32>
    %116 = vector.extract_strided_slice %115 {offsets = [0, 0], sizes = [4, 32], strides = [1, 1]} : vector<4x128xf32> to vector<4x32xf32>
    %117 = arith.negf %116 : vector<4x32xf32>
    %118 = math.exp %117 : vector<4x32xf32>
    %cst_30 = arith.constant 1.000000e+00 : f32
    %119 = vector.broadcast %cst_30 : f32 to vector<4x32xf32>
    %120 = arith.addf %119, %118 : vector<4x32xf32>
    %121 = arith.divf %119, %120 : vector<4x32xf32>
    %122 = vector.extract_strided_slice %115 {offsets = [0, 32], sizes = [4, 32], strides = [1, 1]} : vector<4x128xf32> to vector<4x32xf32>
    %123 = arith.negf %122 : vector<4x32xf32>
    %124 = math.exp %123 : vector<4x32xf32>
    %cst_31 = arith.constant 1.000000e+00 : f32
    %125 = vector.broadcast %cst_31 : f32 to vector<4x32xf32>
    %126 = arith.addf %125, %124 : vector<4x32xf32>
    %127 = arith.divf %125, %126 : vector<4x32xf32>
    %128 = vector.extract_strided_slice %115 {offsets = [0, 64], sizes = [4, 32], strides = [1, 1]} : vector<4x128xf32> to vector<4x32xf32>
    %129 = math.tanh %128 : vector<4x32xf32>
    %130 = vector.extract_strided_slice %115 {offsets = [0, 96], sizes = [4, 32], strides = [1, 1]} : vector<4x128xf32> to vector<4x32xf32>
    %131 = arith.negf %130 : vector<4x32xf32>
    %132 = math.exp %131 : vector<4x32xf32>
    %cst_32 = arith.constant 1.000000e+00 : f32
    %133 = vector.broadcast %cst_32 : f32 to vector<4x32xf32>
    %134 = arith.addf %133, %132 : vector<4x32xf32>
    %135 = arith.divf %133, %134 : vector<4x32xf32>
    %136 = arith.mulf %127, %103 : vector<4x32xf32>
    %137 = arith.mulf %121, %129 : vector<4x32xf32>
    %138 = arith.addf %136, %137 : vector<4x32xf32>
    %139 = math.tanh %138 : vector<4x32xf32>
    %140 = arith.mulf %135, %139 : vector<4x32xf32>
    %141 = arith.index_cast %c3_i32 : i32 to index
    %c0_33 = arith.constant 0 : index
    %c0_34 = arith.constant 0 : index
    %142 = vector.load %arg10[%141, %c0_33, %c0_34] : memref<8x4x32xf32, #tpu.memory_space<vmem>>, vector<1x4x32xf32>
    %143 = vector.shape_cast %142 : vector<1x4x32xf32> to vector<4x32xf32>
    %144 = vector.shape_cast %140 : vector<4x32xf32> to vector<1x4x32xf32>
    tpu.vector_store %arg10[%141, %c0_33, %c0_34], %144 {strides = array<i32>} : memref<8x4x32xf32, #tpu.memory_space<vmem>>, vector<1x4x32xf32>,
    %c4_i32 = arith.constant 4 : i32
    %145 = arith.index_cast %c4_i32 : i32 to index
    %c0_35 = arith.constant 0 : index
    %c0_36 = arith.constant 0 : index
    %146 = vector.load %arg0[%145, %c0_35, %c0_36] : memref<8x4x16xf32, #tpu.memory_space<vmem>>, vector<1x4x16xf32>
    %147 = vector.shape_cast %146 : vector<1x4x16xf32> to vector<4x16xf32>
    %148 = tpu.concatenate %147, %140 in 1 : vector<4x16xf32>, vector<4x32xf32> -> vector<4x48xf32>
    %cst_37 = arith.constant dense<0.000000e+00> : vector<4x128xf32>
    %149 = tpu.matmul %148, %0, %cst_37 {dimension_numbers = #tpu.dot_dimension_numbers<[1], [0], [0], [1], [0, 0, 1, 1], [], []>} : vector<4x48xf32>, vector<48x128xf32>, vector<4x128xf32> -> vector<4x128xf32>
    %150 = arith.addf %149, %3 : vector<4x128xf32>
    %151 = vector.extract_strided_slice %150 {offsets = [0, 0], sizes = [4, 32], strides = [1, 1]} : vector<4x128xf32> to vector<4x32xf32>
    %152 = arith.negf %151 : vector<4x32xf32>
    %153 = math.exp %152 : vector<4x32xf32>
    %cst_38 = arith.constant 1.000000e+00 : f32
    %154 = vector.broadcast %cst_38 : f32 to vector<4x32xf32>
    %155 = arith.addf %154, %153 : vector<4x32xf32>
    %156 = arith.divf %154, %155 : vector<4x32xf32>
    %157 = vector.extract_strided_slice %150 {offsets = [0, 32], sizes = [4, 32], strides = [1, 1]} : vector<4x128xf32> to vector<4x32xf32>
    %158 = arith.negf %157 : vector<4x32xf32>
    %159 = math.exp %158 : vector<4x32xf32>
    %cst_39 = arith.constant 1.000000e+00 : f32
    %160 = vector.broadcast %cst_39 : f32 to vector<4x32xf32>
    %161 = arith.addf %160, %159 : vector<4x32xf32>
    %162 = arith.divf %160, %161 : vector<4x32xf32>
    %163 = vector.extract_strided_slice %150 {offsets = [0, 64], sizes = [4, 32], strides = [1, 1]} : vector<4x128xf32> to vector<4x32xf32>
    %164 = math.tanh %163 : vector<4x32xf32>
    %165 = vector.extract_strided_slice %150 {offsets = [0, 96], sizes = [4, 32], strides = [1, 1]} : vector<4x128xf32> to vector<4x32xf32>
    %166 = arith.negf %165 : vector<4x32xf32>
    %167 = math.exp %166 : vector<4x32xf32>
    %cst_40 = arith.constant 1.000000e+00 : f32
    %168 = vector.broadcast %cst_40 : f32 to vector<4x32xf32>
    %169 = arith.addf %168, %167 : vector<4x32xf32>
    %170 = arith.divf %168, %169 : vector<4x32xf32>
    %171 = arith.mulf %162, %138 : vector<4x32xf32>
    %172 = arith.mulf %156, %164 : vector<4x32xf32>
    %173 = arith.addf %171, %172 : vector<4x32xf32>
    %174 = math.tanh %173 : vector<4x32xf32>
    %175 = arith.mulf %170, %174 : vector<4x32xf32>
    %176 = arith.index_cast %c4_i32 : i32 to index
    %c0_41 = arith.constant 0 : index
    %c0_42 = arith.constant 0 : index
    %177 = vector.load %arg10[%176, %c0_41, %c0_42] : memref<8x4x32xf32, #tpu.memory_space<vmem>>, vector<1x4x32xf32>
    %178 = vector.shape_cast %177 : vector<1x4x32xf32> to vector<4x32xf32>
    %179 = vector.shape_cast %175 : vector<4x32xf32> to vector<1x4x32xf32>
    tpu.vector_store %arg10[%176, %c0_41, %c0_42], %179 {strides = array<i32>} : memref<8x4x32xf32, #tpu.memory_space<vmem>>, vector<1x4x32xf32>,
    %c5_i32 = arith.constant 5 : i32
    %180 = arith.index_cast %c5_i32 : i32 to index
    %c0_43 = arith.constant 0 : index
    %c0_44 = arith.constant 0 : index
    %181 = vector.load %arg0[%180, %c0_43, %c0_44] : memref<8x4x16xf32, #tpu.memory_space<vmem>>, vector<1x4x16xf32>
    %182 = vector.shape_cast %181 : vector<1x4x16xf32> to vector<4x16xf32>
    %183 = tpu.concatenate %182, %175 in 1 : vector<4x16xf32>, vector<4x32xf32> -> vector<4x48xf32>
    %cst_45 = arith.constant dense<0.000000e+00> : vector<4x128xf32>
    %184 = tpu.matmul %183, %0, %cst_45 {dimension_numbers = #tpu.dot_dimension_numbers<[1], [0], [0], [1], [0, 0, 1, 1], [], []>} : vector<4x48xf32>, vector<48x128xf32>, vector<4x128xf32> -> vector<4x128xf32>
    %185 = arith.addf %184, %3 : vector<4x128xf32>
    %186 = vector.extract_strided_slice %185 {offsets = [0, 0], sizes = [4, 32], strides = [1, 1]} : vector<4x128xf32> to vector<4x32xf32>
    %187 = arith.negf %186 : vector<4x32xf32>
    %188 = math.exp %187 : vector<4x32xf32>
    %cst_46 = arith.constant 1.000000e+00 : f32
    %189 = vector.broadcast %cst_46 : f32 to vector<4x32xf32>
    %190 = arith.addf %189, %188 : vector<4x32xf32>
    %191 = arith.divf %189, %190 : vector<4x32xf32>
    %192 = vector.extract_strided_slice %185 {offsets = [0, 32], sizes = [4, 32], strides = [1, 1]} : vector<4x128xf32> to vector<4x32xf32>
    %193 = arith.negf %192 : vector<4x32xf32>
    %194 = math.exp %193 : vector<4x32xf32>
    %cst_47 = arith.constant 1.000000e+00 : f32
    %195 = vector.broadcast %cst_47 : f32 to vector<4x32xf32>
    %196 = arith.addf %195, %194 : vector<4x32xf32>
    %197 = arith.divf %195, %196 : vector<4x32xf32>
    %198 = vector.extract_strided_slice %185 {offsets = [0, 64], sizes = [4, 32], strides = [1, 1]} : vector<4x128xf32> to vector<4x32xf32>
    %199 = math.tanh %198 : vector<4x32xf32>
    %200 = vector.extract_strided_slice %185 {offsets = [0, 96], sizes = [4, 32], strides = [1, 1]} : vector<4x128xf32> to vector<4x32xf32>
    %201 = arith.negf %200 : vector<4x32xf32>
    %202 = math.exp %201 : vector<4x32xf32>
    %cst_48 = arith.constant 1.000000e+00 : f32
    %203 = vector.broadcast %cst_48 : f32 to vector<4x32xf32>
    %204 = arith.addf %203, %202 : vector<4x32xf32>
    %205 = arith.divf %203, %204 : vector<4x32xf32>
    %206 = arith.mulf %197, %173 : vector<4x32xf32>
    %207 = arith.mulf %191, %199 : vector<4x32xf32>
    %208 = arith.addf %206, %207 : vector<4x32xf32>
    %209 = math.tanh %208 : vector<4x32xf32>
    %210 = arith.mulf %205, %209 : vector<4x32xf32>
    %211 = arith.index_cast %c5_i32 : i32 to index
    %c0_49 = arith.constant 0 : index
    %c0_50 = arith.constant 0 : index
    %212 = vector.load %arg10[%211, %c0_49, %c0_50] : memref<8x4x32xf32, #tpu.memory_space<vmem>>, vector<1x4x32xf32>
    %213 = vector.shape_cast %212 : vector<1x4x32xf32> to vector<4x32xf32>
    %214 = vector.shape_cast %210 : vector<4x32xf32> to vector<1x4x32xf32>
    tpu.vector_store %arg10[%211, %c0_49, %c0_50], %214 {strides = array<i32>} : memref<8x4x32xf32, #tpu.memory_space<vmem>>, vector<1x4x32xf32>,
    %c6_i32 = arith.constant 6 : i32
    %215 = arith.index_cast %c6_i32 : i32 to index
    %c0_51 = arith.constant 0 : index
    %c0_52 = arith.constant 0 : index
    %216 = vector.load %arg0[%215, %c0_51, %c0_52] : memref<8x4x16xf32, #tpu.memory_space<vmem>>, vector<1x4x16xf32>
    %217 = vector.shape_cast %216 : vector<1x4x16xf32> to vector<4x16xf32>
    %218 = tpu.concatenate %217, %210 in 1 : vector<4x16xf32>, vector<4x32xf32> -> vector<4x48xf32>
    %cst_53 = arith.constant dense<0.000000e+00> : vector<4x128xf32>
    %219 = tpu.matmul %218, %0, %cst_53 {dimension_numbers = #tpu.dot_dimension_numbers<[1], [0], [0], [1], [0, 0, 1, 1], [], []>} : vector<4x48xf32>, vector<48x128xf32>, vector<4x128xf32> -> vector<4x128xf32>
    %220 = arith.addf %219, %3 : vector<4x128xf32>
    %221 = vector.extract_strided_slice %220 {offsets = [0, 0], sizes = [4, 32], strides = [1, 1]} : vector<4x128xf32> to vector<4x32xf32>
    %222 = arith.negf %221 : vector<4x32xf32>
    %223 = math.exp %222 : vector<4x32xf32>
    %cst_54 = arith.constant 1.000000e+00 : f32
    %224 = vector.broadcast %cst_54 : f32 to vector<4x32xf32>
    %225 = arith.addf %224, %223 : vector<4x32xf32>
    %226 = arith.divf %224, %225 : vector<4x32xf32>
    %227 = vector.extract_strided_slice %220 {offsets = [0, 32], sizes = [4, 32], strides = [1, 1]} : vector<4x128xf32> to vector<4x32xf32>
    %228 = arith.negf %227 : vector<4x32xf32>
    %229 = math.exp %228 : vector<4x32xf32>
    %cst_55 = arith.constant 1.000000e+00 : f32
    %230 = vector.broadcast %cst_55 : f32 to vector<4x32xf32>
    %231 = arith.addf %230, %229 : vector<4x32xf32>
    %232 = arith.divf %230, %231 : vector<4x32xf32>
    %233 = vector.extract_strided_slice %220 {offsets = [0, 64], sizes = [4, 32], strides = [1, 1]} : vector<4x128xf32> to vector<4x32xf32>
    %234 = math.tanh %233 : vector<4x32xf32>
    %235 = vector.extract_strided_slice %220 {offsets = [0, 96], sizes = [4, 32], strides = [1, 1]} : vector<4x128xf32> to vector<4x32xf32>
    %236 = arith.negf %235 : vector<4x32xf32>
    %237 = math.exp %236 : vector<4x32xf32>
    %cst_56 = arith.constant 1.000000e+00 : f32
    %238 = vector.broadcast %cst_56 : f32 to vector<4x32xf32>
    %239 = arith.addf %238, %237 : vector<4x32xf32>
    %240 = arith.divf %238, %239 : vector<4x32xf32>
    %241 = arith.mulf %232, %208 : vector<4x32xf32>
    %242 = arith.mulf %226, %234 : vector<4x32xf32>
    %243 = arith.addf %241, %242 : vector<4x32xf32>
    %244 = math.tanh %243 : vector<4x32xf32>
    %245 = arith.mulf %240, %244 : vector<4x32xf32>
    %246 = arith.index_cast %c6_i32 : i32 to index
    %c0_57 = arith.constant 0 : index
    %c0_58 = arith.constant 0 : index
    %247 = vector.load %arg10[%246, %c0_57, %c0_58] : memref<8x4x32xf32, #tpu.memory_space<vmem>>, vector<1x4x32xf32>
    %248 = vector.shape_cast %247 : vector<1x4x32xf32> to vector<4x32xf32>
    %249 = vector.shape_cast %245 : vector<4x32xf32> to vector<1x4x32xf32>
    tpu.vector_store %arg10[%246, %c0_57, %c0_58], %249 {strides = array<i32>} : memref<8x4x32xf32, #tpu.memory_space<vmem>>, vector<1x4x32xf32>,
    %c7_i32 = arith.constant 7 : i32
    %250 = arith.index_cast %c7_i32 : i32 to index
    %c0_59 = arith.constant 0 : index
    %c0_60 = arith.constant 0 : index
    %251 = vector.load %arg0[%250, %c0_59, %c0_60] : memref<8x4x16xf32, #tpu.memory_space<vmem>>, vector<1x4x16xf32>
    %252 = vector.shape_cast %251 : vector<1x4x16xf32> to vector<4x16xf32>
    %253 = tpu.concatenate %252, %245 in 1 : vector<4x16xf32>, vector<4x32xf32> -> vector<4x48xf32>
    %cst_61 = arith.constant dense<0.000000e+00> : vector<4x128xf32>
    %254 = tpu.matmul %253, %0, %cst_61 {dimension_numbers = #tpu.dot_dimension_numbers<[1], [0], [0], [1], [0, 0, 1, 1], [], []>} : vector<4x48xf32>, vector<48x128xf32>, vector<4x128xf32> -> vector<4x128xf32>
    %255 = arith.addf %254, %3 : vector<4x128xf32>
    %256 = vector.extract_strided_slice %255 {offsets = [0, 0], sizes = [4, 32], strides = [1, 1]} : vector<4x128xf32> to vector<4x32xf32>
    %257 = arith.negf %256 : vector<4x32xf32>
    %258 = math.exp %257 : vector<4x32xf32>
    %cst_62 = arith.constant 1.000000e+00 : f32
    %259 = vector.broadcast %cst_62 : f32 to vector<4x32xf32>
    %260 = arith.addf %259, %258 : vector<4x32xf32>
    %261 = arith.divf %259, %260 : vector<4x32xf32>
    %262 = vector.extract_strided_slice %255 {offsets = [0, 32], sizes = [4, 32], strides = [1, 1]} : vector<4x128xf32> to vector<4x32xf32>
    %263 = arith.negf %262 : vector<4x32xf32>
    %264 = math.exp %263 : vector<4x32xf32>
    %cst_63 = arith.constant 1.000000e+00 : f32
    %265 = vector.broadcast %cst_63 : f32 to vector<4x32xf32>
    %266 = arith.addf %265, %264 : vector<4x32xf32>
    %267 = arith.divf %265, %266 : vector<4x32xf32>
    %268 = vector.extract_strided_slice %255 {offsets = [0, 64], sizes = [4, 32], strides = [1, 1]} : vector<4x128xf32> to vector<4x32xf32>
    %269 = math.tanh %268 : vector<4x32xf32>
    %270 = vector.extract_strided_slice %255 {offsets = [0, 96], sizes = [4, 32], strides = [1, 1]} : vector<4x128xf32> to vector<4x32xf32>
    %271 = arith.negf %270 : vector<4x32xf32>
    %272 = math.exp %271 : vector<4x32xf32>
    %cst_64 = arith.constant 1.000000e+00 : f32
    %273 = vector.broadcast %cst_64 : f32 to vector<4x32xf32>
    %274 = arith.addf %273, %272 : vector<4x32xf32>
    %275 = arith.divf %273, %274 : vector<4x32xf32>
    %276 = arith.mulf %267, %243 : vector<4x32xf32>
    %277 = arith.mulf %261, %269 : vector<4x32xf32>
    %278 = arith.addf %276, %277 : vector<4x32xf32>
    %279 = math.tanh %278 : vector<4x32xf32>
    %280 = arith.mulf %275, %279 : vector<4x32xf32>
    %281 = arith.index_cast %c7_i32 : i32 to index
    %c0_65 = arith.constant 0 : index
    %c0_66 = arith.constant 0 : index
    %282 = vector.load %arg10[%281, %c0_65, %c0_66] : memref<8x4x32xf32, #tpu.memory_space<vmem>>, vector<1x4x32xf32>
    %283 = vector.shape_cast %282 : vector<1x4x32xf32> to vector<4x32xf32>
    %284 = vector.shape_cast %280 : vector<4x32xf32> to vector<1x4x32xf32>
    tpu.vector_store %arg10[%281, %c0_65, %c0_66], %284 {strides = array<i32>} : memref<8x4x32xf32, #tpu.memory_space<vmem>>, vector<1x4x32xf32>,
    %c8_i32 = arith.constant 8 : i32
    %c0_67 = arith.constant 0 : index
    %c0_68 = arith.constant 0 : index
    %c0_69 = arith.constant 0 : index
    %285 = vector.load %arg10[%c0_67, %c0_68, %c0_69] : memref<8x4x32xf32, #tpu.memory_space<vmem>>, vector<8x4x32xf32>
    %cst_70 = arith.constant 0.000000e+00 : f32
    %286 = vector.broadcast %cst_70 : f32 to vector<8x1024xf32>
    %287 = vector.extract_strided_slice %285 {offsets = [0, 0, 0], sizes = [8, 1, 32], strides = [1, 1, 1]} : vector<8x4x32xf32> to vector<8x1x32xf32>
    %288 = vector.shape_cast %287 : vector<8x1x32xf32> to vector<8x32xf32>
    %c0_71 = arith.constant 0 : index
    %c0_72 = arith.constant 0 : index
    %c0_73 = arith.constant 0 : index
    %289 = vector.load %arg4[%c0_71, %c0_72, %c0_73] : memref<4x32x1024xf32, #tpu.memory_space<vmem>>, vector<1x32x1024xf32>
    %290 = vector.shape_cast %289 : vector<1x32x1024xf32> to vector<32x1024xf32>
    %cst_74 = arith.constant dense<0.000000e+00> : vector<8x1024xf32>
    %291 = tpu.matmul %288, %290, %cst_74 {dimension_numbers = #tpu.dot_dimension_numbers<[1], [0], [0], [1], [0, 0, 1, 1], [], []>} : vector<8x32xf32>, vector<32x1024xf32>, vector<8x1024xf32> -> vector<8x1024xf32>
    %292 = arith.addf %286, %291 : vector<8x1024xf32>
    %293 = vector.extract_strided_slice %285 {offsets = [0, 1, 0], sizes = [8, 1, 32], strides = [1, 1, 1]} : vector<8x4x32xf32> to vector<8x1x32xf32>
    %294 = vector.shape_cast %293 : vector<8x1x32xf32> to vector<8x32xf32>
    %c1 = arith.constant 1 : index
    %c0_75 = arith.constant 0 : index
    %c0_76 = arith.constant 0 : index
    %295 = vector.load %arg4[%c1, %c0_75, %c0_76] : memref<4x32x1024xf32, #tpu.memory_space<vmem>>, vector<1x32x1024xf32>
    %296 = vector.shape_cast %295 : vector<1x32x1024xf32> to vector<32x1024xf32>
    %cst_77 = arith.constant dense<0.000000e+00> : vector<8x1024xf32>
    %297 = tpu.matmul %294, %296, %cst_77 {dimension_numbers = #tpu.dot_dimension_numbers<[1], [0], [0], [1], [0, 0, 1, 1], [], []>} : vector<8x32xf32>, vector<32x1024xf32>, vector<8x1024xf32> -> vector<8x1024xf32>
    %298 = arith.addf %292, %297 : vector<8x1024xf32>
    %299 = vector.extract_strided_slice %285 {offsets = [0, 2, 0], sizes = [8, 1, 32], strides = [1, 1, 1]} : vector<8x4x32xf32> to vector<8x1x32xf32>
    %300 = vector.shape_cast %299 : vector<8x1x32xf32> to vector<8x32xf32>
    %c2 = arith.constant 2 : index
    %c0_78 = arith.constant 0 : index
    %c0_79 = arith.constant 0 : index
    %301 = vector.load %arg4[%c2, %c0_78, %c0_79] : memref<4x32x1024xf32, #tpu.memory_space<vmem>>, vector<1x32x1024xf32>
    %302 = vector.shape_cast %301 : vector<1x32x1024xf32> to vector<32x1024xf32>
    %cst_80 = arith.constant dense<0.000000e+00> : vector<8x1024xf32>
    %303 = tpu.matmul %300, %302, %cst_80 {dimension_numbers = #tpu.dot_dimension_numbers<[1], [0], [0], [1], [0, 0, 1, 1], [], []>} : vector<8x32xf32>, vector<32x1024xf32>, vector<8x1024xf32> -> vector<8x1024xf32>
    %304 = arith.addf %298, %303 : vector<8x1024xf32>
    %305 = vector.extract_strided_slice %285 {offsets = [0, 3, 0], sizes = [8, 1, 32], strides = [1, 1, 1]} : vector<8x4x32xf32> to vector<8x1x32xf32>
    %306 = vector.shape_cast %305 : vector<8x1x32xf32> to vector<8x32xf32>
    %c3 = arith.constant 3 : index
    %c0_81 = arith.constant 0 : index
    %c0_82 = arith.constant 0 : index
    %307 = vector.load %arg4[%c3, %c0_81, %c0_82] : memref<4x32x1024xf32, #tpu.memory_space<vmem>>, vector<1x32x1024xf32>
    %308 = vector.shape_cast %307 : vector<1x32x1024xf32> to vector<32x1024xf32>
    %cst_83 = arith.constant dense<0.000000e+00> : vector<8x1024xf32>
    %309 = tpu.matmul %306, %308, %cst_83 {dimension_numbers = #tpu.dot_dimension_numbers<[1], [0], [0], [1], [0, 0, 1, 1], [], []>} : vector<8x32xf32>, vector<32x1024xf32>, vector<8x1024xf32> -> vector<8x1024xf32>
    %310 = arith.addf %304, %309 : vector<8x1024xf32>
    %c0_84 = arith.constant 0 : index
    %c0_85 = arith.constant 0 : index
    %311 = vector.load %arg5[%c0_84, %c0_85] : memref<1x1024xf32, #tpu.memory_space<vmem>>, vector<1x1024xf32>
    %312 = vector.broadcast %311 : vector<1x1024xf32> to vector<8x1024xf32>
    %313 = arith.addf %310, %312 : vector<8x1024xf32>
    %c0_86 = arith.constant 0 : index
    %c0_87 = arith.constant 0 : index
    %314 = vector.load %arg3[%c0_86, %c0_87] : memref<8x1024xf32, #tpu.memory_space<vmem>>, vector<8x1024xf32>
    %c0_88 = arith.constant 0 : index
    %c0_89 = arith.constant 0 : index
    %315 = vector.load %arg6[%c0_88, %c0_89] : memref<1024x128xf32, #tpu.memory_space<vmem>>, vector<1024x128xf32>
    %cst_90 = arith.constant dense<0.000000e+00> : vector<8x128xf32>
    %316 = tpu.matmul %314, %315, %cst_90 {dimension_numbers = #tpu.dot_dimension_numbers<[1], [0], [0], [1], [0, 0, 1, 1], [], []>} : vector<8x1024xf32>, vector<1024x128xf32>, vector<8x128xf32> -> vector<8x128xf32>
    %c0_91 = arith.constant 0 : index
    %c0_92 = arith.constant 0 : index
    %317 = vector.load %arg7[%c0_91, %c0_92] : memref<1024x128xf32, #tpu.memory_space<vmem>>, vector<1024x128xf32>
    %cst_93 = arith.constant dense<0.000000e+00> : vector<8x128xf32>
    %318 = tpu.matmul %313, %317, %cst_93 {dimension_numbers = #tpu.dot_dimension_numbers<[1], [0], [0], [1], [0, 0, 1, 1], [], []>} : vector<8x1024xf32>, vector<1024x128xf32>, vector<8x128xf32> -> vector<8x128xf32>
    %319 = arith.addf %316, %318 : vector<8x128xf32>
    %c0_94 = arith.constant 0 : index
    %c0_95 = arith.constant 0 : index
    %320 = vector.load %arg8[%c0_94, %c0_95] : memref<1x128xf32, #tpu.memory_space<vmem>>, vector<1x128xf32>
    %321 = vector.broadcast %320 : vector<1x128xf32> to vector<8x128xf32>
    %322 = arith.addf %319, %321 : vector<8x128xf32>
    %c0_96 = arith.constant 0 : index
    %c0_97 = arith.constant 0 : index
    %323 = vector.load %arg9[%c0_96, %c0_97] : memref<8x128xf32, #tpu.memory_space<vmem>>, vector<8x128xf32>
    tpu.vector_store %arg9[%c0_96, %c0_97], %322 {strides = array<i32>} : memref<8x128xf32, #tpu.memory_space<vmem>>, vector<8x128xf32>,
    return
  }
}

</mosaic_0001>

<bundles_post_ra>
// kernel: lstm_decoder_forward.1
= control target key start
LH: loop header
LB: loop body
LE: loop exit
PB: predicated region body
PF: predicated region fallthrough
CT: control target
= control target key end

     0   :  { %14 = vsyncpa [#allocation4], 0  ;;  %s4874_s0 = inlined_call_operand.vmem [shape: f32[8,4,16], index: 0, kind: input, shape index: {}]   ;;  %s4875_s1 = inlined_call_operand.vmem [shape: f32[48,128], index: 1, kind: input, shape index: {}]   ;;  %s4876_s2 = inlined_call_operand.vmem [shape: f32[1,128], index: 2, kind: input, shape index: {}]   ;;  %s4877_s3 = inlined_call_operand.vmem [shape: f32[8,1024], index: 3, kind: input, shape index: {}]   ;;  %s4878_s4 = inlined_call_operand.hbm [shape: f32[4,32,1024], index: 4, kind: input, shape index: {}]   ;;  %s4879_s5 = inlined_call_operand.vmem [shape: f32[1,1024], index: 5, kind: input, shape index: {}]   ;;  %s4880_s6 = inlined_call_operand.hbm [shape: f32[1024,128], index: 6, kind: input, shape index: {}]   ;;  %s4881_s7 = inlined_call_operand.hbm [shape: f32[1024,128], index: 7, kind: input, shape index: {}]   ;;  %s4882_s8 = inlined_call_operand.vmem [shape: f32[1,128], index: 8, kind: input, shape index: {}]   ;;  %s4883_s9 = inlined_call_operand.hbm [shape: f32[8,128], index: 9, kind: output, shape index: {}]  }
   0x1   :  { %15 = vsyncpa [#allocation7], 0 }
   0x2   :  { %16 = vsyncpa [#allocation5], 0  ;;  %s4375_s30 = smov [#allocation6]   ;;  %s4281_s13 = scalar_lea.hbm %s4880_s6, 16384 }
   0x3   :  { %s44_s10 = sshll.u32 %s4375_s30, 4  ;;  %p4282_p0 = scmp.ne.s32.totalorder %s4880_s6, %s4281_s13  ;;  %s45_s10 = int_to_ptr.vmem [resolvable:$true] %s44_s10 }
   0x4   :  { %p4285_p1 = scmp.lt.u32.totalorder %s4281_s13, %s4880_s6 }
   0x6   :  { %p4287_p2 = pnand %p4285_p1, %p4282_p0 }
   0x8   :  { %4290 = shalt.err (!%p4287_p2)
}
   0x9   :  { %s4291_s18 = scalar_lea.vmem %s45_s10, 16384  ;;  %p4296_p4 = scmp.lt.s32.totalorder %s45_s10, %s45_s10 }
   0xa   :  { %p4292_p3 = scmp.ne.s32.totalorder %s45_s10, %s4291_s18  ;;  %p4297_p5 = scmp.lt.s32.totalorder %s4291_s18, %s4291_s18 }
   0xc   :  { %p4298_p6 = por %p4297_p5, %p4296_p4 }
   0xe   :  { %p4299_p7 = pnand %p4298_p6, %p4292_p3 }
  0x10   :  { %4302 = shalt.err (!%p4299_p7)
}
  0x11   :  { %s4376_s19 = smov 128   ;;  %s4377_s20 = smov 8  }
  0x12   :  { %50 = dma.hbm_to_vmem [thread:$0]  %s4880_s6, 16384, %s45_s10, [#allocation7], %s4376_s19, %s4376_s19, %s4377_s20  }
  0x13   :  { %s4378_s23 = smov [#allocation3]   ;;  %s4303_s27 = scalar_lea.hbm %s4878_s4, 16384 }
  0x14   :  { %s30_s24 = sshll.u32 %s4378_s23, 4  ;;  %p4304_p8 = scmp.ne.s32.totalorder %s4878_s4, %s4303_s27  ;;  %s31_s24 = int_to_ptr.vmem [resolvable:$true] %s30_s24 }
  0x15   :  { %p4307_p9 = scmp.lt.u32.totalorder %s4303_s27, %s4878_s4 }
  0x17   :  { %p4309_p10 = pnand %p4307_p9, %p4304_p8 }
  0x19   :  { %4312 = shalt.err (!%p4309_p10)
}
  0x1a   :  { %s4313_s12 = scalar_lea.vmem %s31_s24, 16384  ;;  %p4318_p12 = scmp.lt.s32.totalorder %s31_s24, %s31_s24 }
  0x1b   :  { %p4314_p11 = scmp.ne.s32.totalorder %s31_s24, %s4313_s12  ;;  %p4319_p13 = scmp.lt.s32.totalorder %s4313_s12, %s4313_s12 }
  0x1d   :  { %p4320_p0 = por %p4319_p13, %p4318_p12 }
  0x1f   :  { %p4321_p1 = pnand %p4320_p0, %p4314_p11 }
  0x21   :  { %4324 = shalt.err (!%p4321_p1)
}
  0x22   :  { %s4379_s6 = smov 1024   ;;  %s4380_s10 = smov 64  }
  0x23   :  { %36 = dma.hbm_to_vmem [thread:$0]  %s4878_s4, 16384, %s31_s24, [#allocation4], %s4379_s6, %s4379_s6, %s4380_s10  }
  0x24   :  { %s4381_s15 = smov [#allocation8]   ;;  %s4325_s21 = scalar_lea.hbm %s4881_s7, 16384 }
  0x25   :  { %s56_s16 = sshll.u32 %s4381_s15, 4  ;;  %p4326_p2 = scmp.ne.s32.totalorder %s4881_s7, %s4325_s21  ;;  %s57_s16 = int_to_ptr.vmem [resolvable:$true] %s56_s16 }
  0x26   :  { %p4329_p3 = scmp.lt.u32.totalorder %s4325_s21, %s4881_s7 }
  0x28   :  { %p4331_p4 = pnand %p4329_p3, %p4326_p2 }
  0x2a   :  { %4334 = shalt.err (!%p4331_p4)
}
  0x2b   :  { %s4335_s27 = scalar_lea.vmem %s57_s16, 16384  ;;  %p4340_p6 = scmp.lt.s32.totalorder %s57_s16, %s57_s16 }
  0x2c   :  { %p4336_p5 = scmp.ne.s32.totalorder %s57_s16, %s4335_s27  ;;  %p4341_p7 = scmp.lt.s32.totalorder %s4335_s27, %s4335_s27 }
  0x2e   :  { %p4342_p8 = por %p4341_p7, %p4340_p6 }
  0x30   :  { %p4343_p9 = pnand %p4342_p8, %p4336_p5 }
  0x32   :  { %4346 = shalt.err (!%p4343_p9)
}
  0x33   :  { %62 = dma.hbm_to_vmem [thread:$0]  %s4881_s7, 16384, %s57_s16, [#allocation7], %s4376_s19, %s4376_s19, %s4377_s20  }
  0x34   :  { %4369 = dma.done.wait [#allocation4], 16384  }
  0x35   :  { %4370 = vsyncadd [#allocation4], 4294950912 }
  0x36   :  { %4371 = dma.done.wait [#allocation7], 32768  }
  0x37   :  { %4372 = vsyncadd [#allocation7], 4294934528  ;;  %v4382_v0 = vmov 0.0|0.0   ;;  %vm4383_vm0 = vmmov 0   ;;  %v4384_v1 = vmov 0.0   ;;  %v74_v2 = vld [vmem:[%s4875_s1] sm:$0xff] }
  0x38   :  { %3724 = vmatprep.subr.bf16.mxu0 %v4382_v0  ;;  %3616 = vmatprep.mubr.msk.f32.mxu0 %vm4383_vm0, %v4384_v1  ;;  %v75_v3 = vld [vmem:[%s4875_s1 + $0x8] sm:$0xff]  ;;  %v76_v4 = vld [vmem:[%s4875_s1 + $0x10] sm:$0xff]  ;;  %v77_v6 = vld [vmem:[%s4875_s1 + $0x18] sm:$0xff]  ;;  %vm88_vm1 = vcmask 130048   ;;  %vm90_vm2 = vcmask 392192   ;;  %s4385_s21 = smov 32  }
  0x39   :  { %3733 = vmatprep.subr.bf16.mxu1 %v4382_v0  ;;  %3631 = vmatprep.mubr.msk.f32.mxu1 %vm4383_vm0, %v4384_v1  ;;  %v4496_v5 = vpack.c.bf16 %v75_v3, %v74_v2  ;;  %v4502_v7 = vpack.c.bf16 %v77_v6, %v76_v4  ;;  %v78_v8 = vld [vmem:[%s4875_s1 + $0x20] sm:$0xff]  ;;  %v79_v9 = vld [vmem:[%s4875_s1 + $0x28] sm:$0xff]  ;;  %vm192_vm3 = vcmask 257024   ;;  %vm1039_vm4 = vcmask 1041409   ;;  %s4387_s4 = smov [#allocation9]  }
  0x3a   :  { %v4514_v10 = vpack.c.bf16 %v79_v9, %v78_v8  ;;  %v87_v11 = vld [vmem:[%s4874_s0] sm:$0xf]  ;;  %v3230_v30 = vld [vmem:[%s4874_s0 + $0x4] sm:$0xf]  ;;  %v3233_v49 = vld [vmem:[%s4874_s0 + $0x8] sm:$0xf] }
  0x3b   :  { %3726 = vmatpush3.bf16.msra.mxu0 %v4496_v5  ;;  %3735 = vmatpush3.bf16.msra.mxu1 %v4496_v5  ;;  %v89_v12 = vsel %vm88_vm1, %v87_v11, 0.0  ;;  %v4539_v13 = vld [vmem:[%s4876_s2] ss:$0 sm:$0xff]  ;;  %s4386_s2 = smov 48   ;;  %v3236_v8 = vld [vmem:[%s4874_s0 + $0xc] sm:$0xf] }
  0x3c   :  { %3727 = vmatprep.subr.bf16.mxu0 %v4382_v0  ;;  %3736 = vmatprep.subr.bf16.mxu1 %v4382_v0  ;;  %vm1042_vm5 = vcmask 1042434   ;;  %vm1045_vm6 = vcmask 1043459   ;;  %vm1051_vm7 = vcmask 1045509   ;;  %vm1048_vm8 = vcmask 1044484   ;;  %s3217_s24 = sshll.u32 %s4387_s4, 4  ;;  %s3218_s24 = int_to_ptr.vmem [resolvable:$true] %s3217_s24 }
  0x3d   :  { %vm1054_vm9 = vcmask 1046534   ;;  %vm1057_vm10 = vcmask 1047559   ;;  %vm1059_vm11 = vcmask 261120   ;;  %s4347_s28 = scalar_lea.vmem %s3218_s24, 128  ;;  %p4352_p11 = scmp.lt.s32.totalorder %s3218_s24, %s3218_s24 }
  0x3e   :  { %p4348_p10 = scmp.ne.s32.totalorder %s3218_s24, %s4347_s28  ;;  %p4353_p12 = scmp.lt.s32.totalorder %s4347_s28, %s4347_s28 }
  0x3f   :  { %3729 = vmatpush3.bf16.msra.mxu0 %v4502_v7  ;;  %3738 = vmatpush3.bf16.msra.mxu1 %v4502_v7 }
  0x40   :  { %3730 = vmatprep.subr.bf16.mxu0 %v4382_v0  ;;  %3739 = vmatprep.subr.bf16.mxu1 %v4382_v0  ;;  %p4354_p13 = por %p4353_p12, %p4352_p11 }
  0x42   :  { %p4355_p0 = pnand %p4354_p13, %p4348_p10 }
  0x43   :  { %3732 = vmatpush3.bf16.msra.mxu0 %v4514_v10  ;;  %3741 = vmatpush3.bf16.msra.mxu1 %v4514_v10 }
  0x44   :  { %3742 = vmatprep.subr.bf16.mxu0 %v4382_v0  ;;  %3751 = vmatprep.subr.bf16.mxu1 %v4382_v0 }
  0x46   :  { %3617 = vmatmul.mubr.msk.f32.vlgmr.msra.gmra.mrb[0].mxu0 %vm90_vm2, %v89_v12 }
  0x47   :  { %3744 = vmatpush3.bf16.msra.mxu0 %v4496_v5  ;;  %3646 = vmatprep.mubr.msk.f32.mxu0 %vm4383_vm0, %v4384_v1 }
  0x48   :  { %3745 = vmatprep.subr.bf16.mxu0 %v4382_v0 }
  0x4b   :  { %3747 = vmatpush3.bf16.msra.mxu0 %v4502_v7 }
  0x4c   :  { %3748 = vmatprep.subr.bf16.mxu0 %v4382_v0 }
  0x4f   :  { %3750 = vmatpush3.bf16.msra.mxu0 %v4514_v10 }
  0x50   :  { %3760 = vmatprep.subr.bf16.mxu0 %v4382_v0 }
 0x119   :  { %v160_v14 = vpop.f32.mrb[0].mxu0 }
 0x11a   :  { %v161_v15 = vadd.f32 %v4539_v13, %v160_v14  ;;  %v3618_v16 = vpop.f32.mrb[1].mxu0 }
 0x11c   :  { %4217 = vtanh.f32 %v161_v15  ;;  %v3229_v18 = vmul.f32 -1.442695, %v161_v15 }
 0x11e   :  { %4219 = vpow2.f32 %v3229_v18 }
 0x126   :  { %v4218_v17 = vpop.eup %4217 }
 0x127   :  { %173 = vrot.lane.b32.xlu0 %v4218_v17, %s4380_s10 }
 0x128   :  { %v4220_v19 = vpop.eup %4219 }
 0x129   :  { %v167_v20 = vadd.f32 1.0, %v4220_v19 }
 0x12b   :  { %4221 = vrcp.f32 %v167_v20 }
 0x135   :  { %v4222_v21 = vpop.eup %4221 }
 0x136   :  { %v171_v24 = vmul.f32 0.0, %v4222_v21 }
 0x199   :  { %v174_v22 = vpop.permute.xlu0 %173 }
 0x19a   :  { %v176_v23 = vmul.f32 %v4222_v21, %v174_v22 }
 0x19c   :  { %178 = vrot.lane.b32.xlu0 %v176_v23, %s4385_s21 }
 0x20e   :  { %v179_v25 = vpop.permute.xlu0 %178 }
 0x20f   :  { %v181_v26 = vadd.f32 %v179_v25, %v171_v24 }
 0x211   :  { %4223 = vtanh.f32 %v181_v26 }
 0x21b   :  { %v4224_v27 = vpop.eup %4223 }
 0x21c   :  { %184 = vrot.lane.b32.xlu1 %v4224_v27, %s4380_s10 }
 0x28e   :  { %v185_v28 = vpop.permute.xlu1 %184 }
 0x28f   :  { %v4545_v29 = vmul.f32 %v4222_v21, %v185_v28 }
 0x291   :  { %196 = vrot.lane.b32.xlu1 %v4545_v29, %s4386_s2 }
 0x303   :  { %v197_v31 = vpop.permute.xlu1 %196 }
 0x304   :  { %v199_v32 = vsel %vm88_vm1, %v3230_v30, %v197_v31  ;;  %v3239_v30 = vld [vmem:[%s4874_s0 + $0x10] sm:$0xf] }
 0x305   :  { %3632 = vmatmul.mubr.msk.f32.vlgmr.msra.gmra.mrb[0].mxu1 %vm90_vm2, %v199_v32 }
 0x306   :  { %3753 = vmatpush3.bf16.msra.mxu1 %v4496_v5  ;;  %3661 = vmatprep.mubr.msk.f32.mxu1 %vm4383_vm0, %v4384_v1 }
 0x307   :  { %3754 = vmatprep.subr.bf16.mxu1 %v4382_v0 }
 0x30a   :  { %3756 = vmatpush3.bf16.msra.mxu1 %v4502_v7 }
 0x30b   :  { %3757 = vmatprep.subr.bf16.mxu1 %v4382_v0 }
 0x30e   :  { %3759 = vmatpush3.bf16.msra.mxu1 %v4514_v10 }
 0x30f   :  { %3769 = vmatprep.subr.bf16.mxu1 %v4382_v0 }
 0x3d8   :  { %v269_v33 = vpop.f32.mrb[0].mxu1 }
 0x3d9   :  { %v270_v34 = vadd.f32 %v4539_v13, %v269_v33  ;;  %v3633_v35 = vpop.f32.mrb[1].mxu1 }
 0x3db   :  { %4225 = vtanh.f32 %v270_v34  ;;  %v3232_v37 = vmul.f32 -1.442695, %v270_v34 }
 0x3dd   :  { %4227 = vpow2.f32 %v3232_v37 }
 0x3e5   :  { %v4226_v36 = vpop.eup %4225 }
 0x3e6   :  { %282 = vrot.lane.b32.xlu0 %v4226_v36, %s4380_s10 }
 0x3e7   :  { %v4228_v38 = vpop.eup %4227 }
 0x3e8   :  { %v276_v39 = vadd.f32 1.0, %v4228_v38 }
 0x3ea   :  { %4229 = vrcp.f32 %v276_v39 }
 0x3f4   :  { %v4230_v40 = vpop.eup %4229 }
 0x3f5   :  { %v280_v43 = vmul.f32 %v4230_v40, %v181_v26 }
 0x458   :  { %v283_v41 = vpop.permute.xlu0 %282 }
 0x459   :  { %v285_v42 = vmul.f32 %v4230_v40, %v283_v41 }
 0x45b   :  { %287 = vrot.lane.b32.xlu1 %v285_v42, %s4385_s21 }
 0x4cd   :  { %v288_v44 = vpop.permute.xlu1 %287 }
 0x4ce   :  { %v290_v45 = vadd.f32 %v288_v44, %v280_v43 }
 0x4d0   :  { %4231 = vtanh.f32 %v290_v45 }
 0x4da   :  { %v4232_v46 = vpop.eup %4231 }
 0x4db   :  { %293 = vrot.lane.b32.xlu0 %v4232_v46, %s4380_s10 }
 0x54d   :  { %v294_v47 = vpop.permute.xlu0 %293 }
 0x54e   :  { %v4566_v48 = vmul.f32 %v4230_v40, %v294_v47 }
 0x550   :  { %305 = vrot.lane.b32.xlu1 %v4566_v48, %s4386_s2 }
 0x5c2   :  { %v306_v50 = vpop.permute.xlu1 %305 }
 0x5c3   :  { %v308_v51 = vsel %vm88_vm1, %v3233_v49, %v306_v50  ;;  %v3242_v50 = vld [vmem:[%s4874_s0 + $0x14] sm:$0xf] }
 0x5c4   :  { %3647 = vmatmul.mubr.msk.f32.vlgmr.msra.gmra.mrb[2].mxu0 %vm90_vm2, %v308_v51 }
 0x5c5   :  { %3762 = vmatpush3.bf16.msra.mxu0 %v4496_v5  ;;  %3676 = vmatprep.mubr.msk.f32.mxu0 %vm4383_vm0, %v4384_v1 }
 0x5c6   :  { %3763 = vmatprep.subr.bf16.mxu0 %v4382_v0 }
 0x5c9   :  { %3765 = vmatpush3.bf16.msra.mxu0 %v4502_v7 }
 0x5ca   :  { %3766 = vmatprep.subr.bf16.mxu0 %v4382_v0 }
 0x5cd   :  { %3768 = vmatpush3.bf16.msra.mxu0 %v4514_v10 }
 0x5ce   :  { %3778 = vmatprep.subr.bf16.mxu0 %v4382_v0 }
 0x697   :  { %v378_v52 = vpop.f32.mrb[2].mxu0 }
 0x698   :  { %v379_v53 = vadd.f32 %v4539_v13, %v378_v52  ;;  %v3648_v54 = vpop.f32.mrb[3].mxu0 }
 0x69a   :  { %4233 = vtanh.f32 %v379_v53  ;;  %v3235_v56 = vmul.f32 -1.442695, %v379_v53 }
 0x69c   :  { %4235 = vpow2.f32 %v3235_v56 }
 0x6a4   :  { %v4234_v55 = vpop.eup %4233 }
 0x6a5   :  { %391 = vrot.lane.b32.xlu0 %v4234_v55, %s4380_s10 }
 0x6a6   :  { %v4236_v57 = vpop.eup %4235 }
 0x6a7   :  { %v385_v58 = vadd.f32 1.0, %v4236_v57 }
 0x6a9   :  { %4237 = vrcp.f32 %v385_v58 }
 0x6b3   :  { %v4238_v59 = vpop.eup %4237 }
 0x6b4   :  { %v389_v62 = vmul.f32 %v4238_v59, %v290_v45 }
 0x717   :  { %v392_v60 = vpop.permute.xlu0 %391 }
 0x718   :  { %v394_v61 = vmul.f32 %v4238_v59, %v392_v60 }
 0x71a   :  { %396 = vrot.lane.b32.xlu1 %v394_v61, %s4385_s21 }
 0x78c   :  { %v397_v63 = vpop.permute.xlu1 %396 }
 0x78d   :  { %v399_v2 = vadd.f32 %v397_v63, %v389_v62 }
 0x78f   :  { %4239 = vtanh.f32 %v399_v2 }
 0x799   :  { %v4240_v3 = vpop.eup %4239 }
 0x79a   :  { %402 = vrot.lane.b32.xlu0 %v4240_v3, %s4380_s10  ;;  %v3245_v3 = vld [vmem:[%s4874_s0 + $0x18] sm:$0xf] }
 0x80c   :  { %v403_v4 = vpop.permute.xlu0 %402 }
 0x80d   :  { %v4587_v6 = vmul.f32 %v4238_v59, %v403_v4 }
 0x80f   :  { %414 = vrot.lane.b32.xlu1 %v4587_v6, %s4386_s2 }
 0x881   :  { %v415_v9 = vpop.permute.xlu1 %414 }
 0x882   :  { %v417_v11 = vsel %vm88_vm1, %v3236_v8, %v415_v9 }
 0x883   :  { %3662 = vmatmul.mubr.msk.f32.vlgmr.msra.gmra.mrb[2].mxu1 %vm90_vm2, %v417_v11 }
 0x884   :  { %3771 = vmatpush3.bf16.msra.mxu1 %v4496_v5  ;;  %3691 = vmatprep.mubr.msk.f32.mxu1 %vm4383_vm0, %v4384_v1 }
 0x885   :  { %3772 = vmatprep.subr.bf16.mxu1 %v4382_v0 }
 0x888   :  { %3774 = vmatpush3.bf16.msra.mxu1 %v4502_v7 }
 0x889   :  { %3775 = vmatprep.subr.bf16.mxu1 %v4382_v0 }
 0x88c   :  { %3777 = vmatpush3.bf16.msra.mxu1 %v4514_v10 }
 0x88d   :  { %3787 = vmatprep.subr.bf16.mxu1 %v4382_v0 }
 0x956   :  { %v487_v12 = vpop.f32.mrb[2].mxu1 }
 0x957   :  { %v488_v14 = vadd.f32 %v4539_v13, %v487_v12  ;;  %v3663_v15 = vpop.f32.mrb[3].mxu1 }
 0x959   :  { %4241 = vtanh.f32 %v488_v14  ;;  %v3238_v17 = vmul.f32 -1.442695, %v488_v14 }
 0x95b   :  { %4243 = vpow2.f32 %v3238_v17 }
 0x963   :  { %v4242_v16 = vpop.eup %4241 }
 0x964   :  { %500 = vrot.lane.b32.xlu0 %v4242_v16, %s4380_s10 }
 0x965   :  { %v4244_v18 = vpop.eup %4243 }
 0x966   :  { %v494_v19 = vadd.f32 1.0, %v4244_v18 }
 0x968   :  { %4245 = vrcp.f32 %v494_v19 }
 0x972   :  { %v4246_v20 = vpop.eup %4245 }
 0x973   :  { %v498_v23 = vmul.f32 %v4246_v20, %v399_v2 }
 0x9d6   :  { %v501_v21 = vpop.permute.xlu0 %500 }
 0x9d7   :  { %v503_v22 = vmul.f32 %v4246_v20, %v501_v21 }
 0x9d9   :  { %505 = vrot.lane.b32.xlu1 %v503_v22, %s4385_s21 }
 0xa4b   :  { %v506_v24 = vpop.permute.xlu1 %505 }
 0xa4c   :  { %v508_v25 = vadd.f32 %v506_v24, %v498_v23 }
 0xa4e   :  { %4247 = vtanh.f32 %v508_v25 }
 0xa58   :  { %v4248_v26 = vpop.eup %4247 }
 0xa59   :  { %511 = vrot.lane.b32.xlu0 %v4248_v26, %s4380_s10 }
 0xacb   :  { %v512_v27 = vpop.permute.xlu0 %511 }
 0xacc   :  { %v4608_v28 = vmul.f32 %v4246_v20, %v512_v27  ;;  %v3248_v27 = vld [vmem:[%s4874_s0 + $0x1c] sm:$0xf] }
 0xace   :  { %523 = vrot.lane.b32.xlu1 %v4608_v28, %s4386_s2 }
 0xb40   :  { %v524_v31 = vpop.permute.xlu1 %523 }
 0xb41   :  { %v526_v32 = vsel %vm88_vm1, %v3239_v30, %v524_v31 }
 0xb42   :  { %3677 = vmatmul.mubr.msk.f32.vlgmr.msra.gmra.mrb[4].mxu0 %vm90_vm2, %v526_v32 }
 0xb43   :  { %3780 = vmatpush3.bf16.msra.mxu0 %v4496_v5  ;;  %3706 = vmatprep.mubr.msk.f32.mxu0 %vm4383_vm0, %v4384_v1 }
 0xb44   :  { %3781 = vmatprep.subr.bf16.mxu0 %v4382_v0 }
 0xb47   :  { %3783 = vmatpush3.bf16.msra.mxu0 %v4502_v7 }
 0xb48   :  { %3784 = vmatprep.subr.bf16.mxu0 %v4382_v0 }
 0xb4b   :  { %3786 = vmatpush3.bf16.msra.mxu0 %v4514_v10 }
 0xc15   :  { %v596_v33 = vpop.f32.mrb[4].mxu0 }
 0xc16   :  { %v597_v34 = vadd.f32 %v4539_v13, %v596_v33  ;;  %v3678_v35 = vpop.f32.mrb[5].mxu0 }
 0xc18   :  { %4249 = vtanh.f32 %v597_v34  ;;  %v3241_v37 = vmul.f32 -1.442695, %v597_v34 }
 0xc1a   :  { %4251 = vpow2.f32 %v3241_v37 }
 0xc22   :  { %v4250_v36 = vpop.eup %4249 }
 0xc23   :  { %609 = vrot.lane.b32.xlu0 %v4250_v36, %s4380_s10 }
 0xc24   :  { %v4252_v38 = vpop.eup %4251 }
 0xc25   :  { %v603_v39 = vadd.f32 1.0, %v4252_v38 }
 0xc27   :  { %4253 = vrcp.f32 %v603_v39 }
 0xc31   :  { %v4254_v40 = vpop.eup %4253 }
 0xc32   :  { %v607_v43 = vmul.f32 %v4254_v40, %v508_v25 }
 0xc95   :  { %v610_v41 = vpop.permute.xlu0 %609 }
 0xc96   :  { %v612_v42 = vmul.f32 %v4254_v40, %v610_v41 }
 0xc98   :  { %614 = vrot.lane.b32.xlu1 %v612_v42, %s4385_s21 }
 0xd0a   :  { %v615_v44 = vpop.permute.xlu1 %614 }
 0xd0b   :  { %v617_v45 = vadd.f32 %v615_v44, %v607_v43 }
 0xd0d   :  { %4255 = vtanh.f32 %v617_v45 }
 0xd17   :  { %v4256_v46 = vpop.eup %4255 }
 0xd18   :  { %620 = vrot.lane.b32.xlu0 %v4256_v46, %s4380_s10 }
 0xd8a   :  { %v621_v47 = vpop.permute.xlu0 %620 }
 0xd8b   :  { %v4628_v49 = vmul.f32 %v4254_v40, %v621_v47  ;;  %v999_v47 = vld [vmem:[#allocation3 + $0x108] sm:$0xff] }
 0xd8d   :  { %632 = vrot.lane.b32.xlu1 %v4628_v49, %s4386_s2 }
 0xdff   :  { %v633_v51 = vpop.permute.xlu1 %632 }
 0xe00   :  { %v635_v52 = vsel %vm88_vm1, %v3242_v50, %v633_v51  ;;  %v1001_v50 = vld [vmem:[#allocation3 + $0x118] sm:$0xff] }
 0xe01   :  { %3692 = vmatmul.mubr.msk.f32.vlgmr.msra.gmra.mrb[4].mxu1 %vm90_vm2, %v635_v52  ;;  %v1009_v52 = vld [vmem:[#allocation3 + $0x158] sm:$0xff] }
 0xe02   :  { %3789 = vmatpush3.bf16.msra.mxu1 %v4496_v5  ;;  %3721 = vmatprep.mubr.msk.f32.mxu1 %vm4383_vm0, %v4384_v1 }
 0xe03   :  { %3790 = vmatprep.subr.bf16.mxu1 %v4382_v0 }
 0xe06   :  { %3792 = vmatpush3.bf16.msra.mxu1 %v4502_v7 }
 0xe07   :  { %3793 = vmatprep.subr.bf16.mxu1 %v4382_v0 }
 0xe0a   :  { %3795 = vmatpush3.bf16.msra.mxu1 %v4514_v10 }
 0xed4   :  { %v705_v53 = vpop.f32.mrb[4].mxu1 }
 0xed5   :  { %v706_v54 = vadd.f32 %v4539_v13, %v705_v53  ;;  %v3693_v55 = vpop.f32.mrb[5].mxu1  ;;  %v998_v53 = vld [vmem:[#allocation3 + $0x100] sm:$0xff] }
 0xed6   :  { %v3804_v55 = vpack.c.bf16 %v1009_v52, %v1001_v50  ;;  %v1026_v52 = vld [vmem:[#allocation3 + $0x1e0] sm:$0xff] }
 0xed7   :  { %4257 = vtanh.f32 %v706_v54  ;;  %v3244_v5 = vmul.f32 -1.442695, %v706_v54  ;;  %v1006_v54 = vld [vmem:[#allocation3 + $0x140] sm:$0xff] }
 0xed8   :  { %3805 = vmatprep.subr.bf16.mxu1 %v3804_v55 }
 0xed9   :  { %4259 = vpow2.f32 %v3244_v5  ;;  %v1000_v5 = vld [vmem:[#allocation3 + $0x110] sm:$0xff] }
 0xee1   :  { %v4258_v56 = vpop.eup %4257 }
 0xee2   :  { %718 = vrot.lane.b32.xlu0 %v4258_v56, %s4380_s10  ;;  %v3798_v56 = vpack.c.bf16 %v1006_v54, %v998_v53 }
 0xee3   :  { %v4260_v57 = vpop.eup %4259 }
 0xee4   :  { %v712_v58 = vadd.f32 1.0, %v4260_v57  ;;  %v1008_v57 = vld [vmem:[#allocation3 + $0x150] sm:$0xff] }
 0xee6   :  { %4261 = vrcp.f32 %v712_v58  ;;  %v1015_v58 = vld [vmem:[#allocation3 + $0x188] sm:$0xff] }
 0xef0   :  { %v4262_v59 = vpop.eup %4261 }
 0xef1   :  { %v716_v0 = vmul.f32 %v4262_v59, %v617_v45 }
 0xf54   :  { %v719_v60 = vpop.permute.xlu0 %718 }
 0xf55   :  { %v721_v7 = vmul.f32 %v4262_v59, %v719_v60  ;;  %v1017_v60 = vld [vmem:[#allocation3 + $0x198] sm:$0xff] }
 0xf57   :  { %723 = vrot.lane.b32.xlu1 %v721_v7, %s4385_s21 }
 0xfc9   :  { %v724_v10 = vpop.permute.xlu1 %723 }
 0xfca   :  { %v726_v61 = vadd.f32 %v724_v10, %v716_v0  ;;  %v1014_v10 = vld [vmem:[#allocation3 + $0x180] sm:$0xff] }
 0xfcc   :  { %4263 = vtanh.f32 %v726_v61 }
 0xfd6   :  { %v4264_v62 = vpop.eup %4263 }
 0xfd7   :  { %729 = vrot.lane.b32.xlu0 %v4264_v62, %s4380_s10  ;;  %v1016_v62 = vld [vmem:[#allocation3 + $0x190] sm:$0xff] }
0x1049   :  { %v730_v63 = vpop.permute.xlu0 %729 }
0x104a   :  { %v4648_v2 = vmul.f32 %v4262_v59, %v730_v63  ;;  %v1023_v59 = vld [vmem:[#allocation3 + $0x1c8] sm:$0xff] }
0x104b   :  { %v3800_v7 = vpack.c.bf16 %v1023_v59, %v1015_v58  ;;  %v968_v59 = vld [vmem:[#allocation3 + $0x18] sm:$0xff] }
0x104c   :  { %741 = vrot.lane.b32.xlu1 %v4648_v2, %s4386_s2 }
0x10be   :  { %v742_v4 = vpop.permute.xlu1 %741 }
0x10bf   :  { %v744_v8 = vsel %vm88_vm1, %v3245_v3, %v742_v4  ;;  %v1003_v3 = vld [vmem:[#allocation3 + $0x128] sm:$0xff] }
0x10c0   :  { %3707 = vmatmul.mubr.msk.f32.vlgmr.msra.gmra.mrb[6].mxu0 %vm90_vm2, %v744_v8  ;;  %v1011_v4 = vld [vmem:[#allocation3 + $0x168] sm:$0xff] }
0x10c1   :  { %1126 = vmatprep.mubr.f32.mxu0 %v4384_v1 }
0x1193   :  { %v814_v9 = vpop.f32.mrb[6].mxu0 }
0x1194   :  { %v815_v11 = vadd.f32 %v4539_v13, %v814_v9  ;;  %v3708_v12 = vpop.f32.mrb[7].mxu0  ;;  %v3812_v9 = vpack.c.bf16 %v1011_v4, %v1003_v3  ;;  %v975_v3 = vld [vmem:[#allocation3 + $0x50] sm:$0xff]  ;;  %v982_v4 = vld [vmem:[#allocation3 + $0x88] sm:$0xff] }
0x1195   :  { %v1013_v12 = vld [vmem:[#allocation3 + $0x178] sm:$0xff] }
0x1196   :  { %4265 = vtanh.f32 %v815_v11  ;;  %v3247_v15 = vmul.f32 -1.442695, %v815_v11  ;;  %v1005_v11 = vld [vmem:[#allocation3 + $0x138] sm:$0xff] }
0x1198   :  { %4267 = vpow2.f32 %v3247_v15 }
0x11a0   :  { %v4266_v14 = vpop.eup %4265 }
0x11a1   :  { %827 = vrot.lane.b32.xlu0 %v4266_v14, %s4380_s10  ;;  %v3820_v14 = vpack.c.bf16 %v1013_v12, %v1005_v11  ;;  %v984_v11 = vld [vmem:[#allocation3 + $0x98] sm:$0xff] }
0x11a2   :  { %v4268_v16 = vpop.eup %4267  ;;  %v992_v12 = vld [vmem:[#allocation3 + $0xd8] sm:$0xff] }
0x11a3   :  { %v821_v17 = vadd.f32 1.0, %v4268_v16 }
0x11a5   :  { %4269 = vrcp.f32 %v821_v17 }
0x11af   :  { %v4270_v18 = vpop.eup %4269 }
0x11b0   :  { %v825_v21 = vmul.f32 %v4270_v18, %v726_v61  ;;  %v1022_v61 = vld [vmem:[#allocation3 + $0x1c0] sm:$0xff] }
0x11b1   :  { %v3802_v63 = vpack.c.bf16 %v1022_v61, %v1014_v10  ;;  %v973_v10 = vld [vmem:[#allocation3 + $0x40] sm:$0xff] }
0x1213   :  { %v828_v19 = vpop.permute.xlu0 %827 }
0x1214   :  { %v830_v20 = vmul.f32 %v4270_v18, %v828_v19 }
0x1216   :  { %832 = vrot.lane.b32.xlu1 %v830_v20, %s4385_s21 }
0x1288   :  { %v833_v22 = vpop.permute.xlu1 %832 }
0x1289   :  { %v835_v23 = vadd.f32 %v833_v22, %v825_v21 }
0x128b   :  { %4271 = vtanh.f32 %v835_v23 }
0x1295   :  { %v4272_v24 = vpop.eup %4271 }
0x1296   :  { %838 = vrot.lane.b32.xlu0 %v4272_v24, %s4380_s10 }
0x1308   :  { %v839_v25 = vpop.permute.xlu0 %838 }
0x1309   :  { %v841_v26 = vmul.f32 %v4270_v18, %v839_v25 }
0x130b   :  { %850 = vrot.lane.b32.xlu1 %v841_v26, %s4386_s2 }
0x137d   :  { %v851_v30 = vpop.permute.xlu1 %850 }
0x137e   :  { %v853_v31 = vsel %vm88_vm1, %v3248_v27, %v851_v30 }
0x137f   :  { %3722 = vmatmul.mubr.msk.f32.vlgmr.msra.gmra.mrb[6].mxu1 %vm90_vm2, %v853_v31 }
0x1380   :  { %1197 = vmatprep.mubr.f32.mxu1 %v4384_v1 }
0x1452   :  { %v923_v32 = vpop.f32.mrb[6].mxu1 }
0x1453   :  { %v924_v33 = vadd.f32 %v4539_v13, %v923_v32  ;;  %v3723_v34 = vpop.f32.mrb[7].mxu1 }
0x1455   :  { %4273 = vtanh.f32 %v924_v33  ;;  %v3250_v36 = vmul.f32 -1.442695, %v924_v33 }
0x1457   :  { %4275 = vpow2.f32 %v3250_v36 }
0x145f   :  { %v4274_v35 = vpop.eup %4273 }
0x1460   :  { %936 = vrot.lane.b32.xlu0 %v4274_v35, %s4380_s10 }
0x1461   :  { %v4276_v37 = vpop.eup %4275 }
0x1462   :  { %v930_v38 = vadd.f32 1.0, %v4276_v37 }
0x1464   :  { %4277 = vrcp.f32 %v930_v38  ;;  %v1002_v38 = vld [vmem:[#allocation3 + $0x120] sm:$0xff] }
0x146e   :  { %v4671_v39 = vpop.eup %4277 }
0x146f   :  { %v934_v13 = vmul.f32 %v4671_v39, %v835_v23 }
0x14d2   :  { %v937_v40 = vpop.permute.xlu0 %936 }
0x14d3   :  { %v939_v41 = vmul.f32 %v4671_v39, %v937_v40 }
0x14d5   :  { %941 = vrot.lane.b32.xlu1 %v939_v41, %s4385_s21  ;;  %v1004_v41 = vld [vmem:[#allocation3 + $0x130] sm:$0xff] }
0x14d9   :  { %189 = vrot.lane.b32.xlu1 %v4545_v29, %s4385_s21 }
0x14dd   :  { %298 = vrot.lane.b32.xlu1 %v4566_v48, %s4385_s21 }
0x14e1   :  { %625 = vrot.lane.b32.xlu1 %v4628_v49, %s4385_s21  ;;  %v1007_v49 = vld [vmem:[#allocation3 + $0x148] sm:$0xff] }
0x14e2   :  { %v3796_v51 = vpack.c.bf16 %v1007_v49, %v999_v47 }
0x14e4   :  { %3797 = vmatprep.subr.bf16.mxu0 %v3796_v51  ;;  %v1018_v51 = vld [vmem:[#allocation3 + $0x1a0] sm:$0xff] }
0x14e5   :  { %843 = vrot.lane.b32.xlu1 %v841_v26, %s4385_s21  ;;  %3799 = vmatpush1.bf16.msra.mxu0 %v3798_v56  ;;  %v1020_v56 = vld [vmem:[#allocation3 + $0x1b0] sm:$0xff] }
0x14e6   :  { %3801 = vmatprep.subr.bf16.mxu0 %v3800_v7 }
0x14e9   :  { %3803 = vmatpush1.bf16.msra.mxu0 %v3802_v63 }
0x14ea   :  { %3813 = vmatprep.subr.bf16.mxu0 %v3812_v9  ;;  %v990_v9 = vld [vmem:[#allocation3 + $0xc8] sm:$0xff] }
0x1547   :  { %v942_v42 = vpop.permute.xlu1 %941 }
0x1548   :  { %v944_v43 = vadd.f32 %v942_v42, %v934_v13  ;;  %v1012_v13 = vld [vmem:[#allocation3 + $0x170] sm:$0xff]  ;;  %v1019_v42 = vld [vmem:[#allocation3 + $0x1a8] sm:$0xff] }
0x1549   :  { %v3822_v50 = vpack.c.bf16 %v1012_v13, %v1004_v41 }
0x154a   :  { %4279 = vtanh.f32 %v944_v43 }
0x154b   :  { %v190_v44 = vpop.permute.xlu1 %189 }
0x154c   :  { %193 = vst.msk [vmem:[#allocation2] sm:$0xf] %vm192_vm3, %v190_v44  ;;  %v1027_v44 = vld [vmem:[#allocation3 + $0x1e8] sm:$0xff] }
0x154d   :  { %v3816_v54 = vpack.c.bf16 %v1027_v44, %v1019_v42  ;;  %v969_v42 = vld [vmem:[#allocation3 + $0x20] sm:$0xff] }
0x154f   :  { %v299_v45 = vpop.permute.xlu1 %298 }
0x1550   :  { %302 = vst.msk [vmem:[#allocation2 + $0x4] sm:$0xf] %vm192_vm3, %v299_v45  ;;  %v1021_v45 = vld [vmem:[#allocation3 + $0x1b8] sm:$0xff] }
0x1553   :  { %v626_v29 = vpop.permute.xlu1 %625  ;;  %v4701_v21 = vld [vmem:[#allocation2] sm:$0xf] }
0x1554   :  { %v4280_v46 = vpop.eup %4279  ;;  %629 = vst.msk [vmem:[#allocation2 + $0x10] sm:$0xf] %vm192_vm3, %v626_v29  ;;  %v1038_v25 = vrot.slane %v4701_v21, 1  ;;  %v1029_v29 = vld [vmem:[#allocation3 + $0x1f8] sm:$0xff] }
0x1555   :  { %947 = vrot.lane.b32.xlu0 %v4280_v46, %s4380_s10  ;;  %v3824_v55 = vpack.c.bf16 %v1029_v29, %v1021_v45 }
0x1557   :  { %v844_v48 = vpop.permute.xlu1 %843  ;;  %v4705_v23 = vld [vmem:[#allocation2 + $0x4] sm:$0xf] }
0x1558   :  { %847 = vst.msk [vmem:[#allocation2 + $0x18] sm:$0xf] %vm192_vm3, %v844_v48  ;;  %v1040_v32 = vsel %vm1039_vm4, %v4705_v23, %v1038_v25  ;;  %v1346_v61 = vrot.slane %v4705_v23, 7  ;;  %v3840_v25 = vpack.c.bf16 %v992_v12, %v984_v11 }
0x1559   :  { %407 = vrot.lane.b32.xlu0 %v4587_v6, %s4385_s21  ;;  %v3806_v6 = vpack.c.bf16 %v1008_v57, %v1000_v5  ;;  %v1028_v5 = vld [vmem:[#allocation3 + $0x1f0] sm:$0xff]  ;;  %v966_v57 = vld [vmem:[#allocation3 + $0x8] sm:$0xff] }
0x155a   :  { %v3826_v7 = vpack.c.bf16 %v1028_v5, %v1020_v56 }
0x155b   :  { %3807 = vmatpush1.bf16.msra.mxu1 %v3806_v6  ;;  %v4713_v31 = vld [vmem:[#allocation2 + $0x10] sm:$0xf]  ;;  %v974_v6 = vld [vmem:[#allocation3 + $0x48] sm:$0xff] }
0x155c   :  { %v1047_v36 = vrot.slane %v4713_v31, 5 }
0x155d   :  { %516 = vrot.lane.b32.xlu0 %v4608_v28, %s4385_s21  ;;  %v1025_v28 = vld [vmem:[#allocation3 + $0x1d8] sm:$0xff] }
0x155e   :  { %v3808_v0 = vpack.c.bf16 %v1025_v28, %v1017_v60  ;;  %v976_v60 = vld [vmem:[#allocation3 + $0x58] sm:$0xff]  ;;  %v3818_v28 = vpack.c.bf16 %v1026_v52, %v1018_v51  ;;  %v994_v52 = vld [vmem:[#allocation3 + $0xe8] sm:$0xff] }
0x155f   :  { %v4721_v37 = vld [vmem:[#allocation2 + $0x18] sm:$0xf]  ;;  %v3836_v63 = vpack.c.bf16 %v976_v60, %v968_v59 }
0x1560   :  { %3809 = vmatprep.subr.bf16.mxu1 %v3808_v0  ;;  %v1053_v48 = vrot.slane %v4721_v37, 3  ;;  %v965_v0 = vld [vmem:[#allocation3] sm:$0xff] }
0x1561   :  { %734 = vrot.lane.b32.xlu0 %v4648_v2, %s4385_s21  ;;  %v1024_v2 = vld [vmem:[#allocation3 + $0x1d0] sm:$0xff] }
0x1562   :  { %v3810_v8 = vpack.c.bf16 %v1024_v2, %v1016_v62  ;;  %v3828_v62 = vpack.c.bf16 %v974_v6, %v966_v57  ;;  %v967_v2 = vld [vmem:[#allocation3 + $0x10] sm:$0xff]  ;;  %v985_v57 = vld [vmem:[#allocation3 + $0xa0] sm:$0xff] }
0x1564   :  { %3811 = vmatpush1.bf16.msra.mxu1 %v3810_v8 }
0x1565   :  { %3821 = vmatprep.subr.bf16.mxu1 %v3820_v14 }
0x15c7   :  { %v948_v15 = vpop.permute.xlu0 %947 }
0x15c8   :  { %v950_v16 = vmul.f32 %v4671_v39, %v948_v15  ;;  %v1010_v39 = vld [vmem:[#allocation3 + $0x160] sm:$0xff]  ;;  %v3830_v15 = vpack.c.bf16 %v973_v10, %v965_v0  ;;  %v1648_v0 = vld [vmem:[#allocation3 + $0x208] sm:$0xff] }
0x15c9   :  { %v3814_v49 = vpack.c.bf16 %v1010_v39, %v1002_v38  ;;  %v972_v38 = vld [vmem:[#allocation3 + $0x38] sm:$0xff] }
0x15ca   :  { %952 = vrot.lane.b32.xlu0 %v950_v16, %s4385_s21  ;;  %v3838_v16 = vpack.c.bf16 %v975_v3, %v967_v2  ;;  %v980_v39 = vld [vmem:[#allocation3 + $0x78] sm:$0xff] }
0x15cb   :  { %v408_v17 = vpop.permute.xlu0 %407  ;;  %v3852_v29 = vpack.c.bf16 %v980_v39, %v972_v38  ;;  %v1665_v38 = vld [vmem:[#allocation3 + $0x290] sm:$0xff] }
0x15cc   :  { %411 = vst.msk [vmem:[#allocation2 + $0x8] sm:$0xf] %vm192_vm3, %v408_v17  ;;  %v981_v17 = vld [vmem:[#allocation3 + $0x80] sm:$0xff]  ;;  %v1673_v39 = vld [vmem:[#allocation3 + $0x2d0] sm:$0xff] }
0x15cf   :  { %v517_v18 = vpop.permute.xlu0 %516 }
0x15d0   :  { %520 = vst.msk [vmem:[#allocation2 + $0xc] sm:$0xf] %vm192_vm3, %v517_v18  ;;  %v989_v18 = vld [vmem:[#allocation3 + $0xc0] sm:$0xff] }
0x15d1   :  { %v3834_v41 = vpack.c.bf16 %v989_v18, %v981_v17  ;;  %v1672_v17 = vld [vmem:[#allocation3 + $0x2c8] sm:$0xff]  ;;  %v1666_v18 = vld [vmem:[#allocation3 + $0x298] sm:$0xff] }
0x15d3   :  { %v735_v19 = vpop.permute.xlu0 %734  ;;  %v4699_v20 = vld [vmem:[#allocation2 + $0x8] sm:$0xf] }
0x15d4   :  { %738 = vst.msk [vmem:[#allocation2 + $0x14] sm:$0xf] %vm192_vm3, %v735_v19  ;;  %v1041_v24 = vrot.slane %v4699_v20, 7  ;;  %v1348_v8 = vrot.slane %v4699_v20, 6  ;;  %v1347_v19 = vsel %vm1039_vm4, %v1346_v61, %v4701_v21  ;;  %v1656_v61 = vld [vmem:[#allocation3 + $0x248] sm:$0xff] }
0x15d5   :  { %v3860_v11 = vpack.c.bf16 %v1656_v61, %v1648_v0  ;;  %v1667_v0 = vld [vmem:[#allocation3 + $0x2a0] sm:$0xff] }
0x15d6   :  { %v1043_v33 = vsel %vm1042_vm5, %v1041_v24, %v1040_v32  ;;  %v3832_v24 = vpack.c.bf16 %v990_v9, %v982_v4  ;;  %v1349_v32 = vsel %vm1042_vm5, %v1348_v8, %v1347_v19  ;;  %v1647_v4 = vld [vmem:[#allocation3 + $0x200] sm:$0xff]  ;;  %v1680_v9 = vrot.slane %v4705_v23, 1  ;;  %v1674_v19 = vld [vmem:[#allocation3 + $0x2d8] sm:$0xff] }
0x15d7   :  { %v4703_v22 = vld [vmem:[#allocation2 + $0xc] sm:$0xf]  ;;  %v1655_v8 = vld [vmem:[#allocation3 + $0x240] sm:$0xff] }
0x15d8   :  { %v1044_v26 = vrot.slane %v4703_v22, 6  ;;  %v1350_v14 = vrot.slane %v4703_v22, 5 }
0x15da   :  { %v1046_v34 = vsel %vm1045_vm6, %v1044_v26, %v1043_v33  ;;  %v983_v26 = vld [vmem:[#allocation3 + $0x90] sm:$0xff]  ;;  %v970_v33 = vld [vmem:[#allocation3 + $0x28] sm:$0xff] }
0x15db   :  { %v4710_v30 = vld [vmem:[#allocation2 + $0x14] sm:$0xf]  ;;  %v1049_v40 = vsel %vm1048_vm8, %v1047_v36, %v1046_v34  ;;  %v1351_v34 = vsel %vm1045_vm6, %v1350_v14, %v1349_v32  ;;  %v978_v36 = vld [vmem:[#allocation3 + $0x68] sm:$0xff]  ;;  %v1663_v32 = vld [vmem:[#allocation3 + $0x280] sm:$0xff] }
0x15dc   :  { %v1050_v35 = vrot.slane %v4710_v30, 4  ;;  %v3844_v45 = vpack.c.bf16 %v978_v36, %v970_v33  ;;  %v1649_v14 = vld [vmem:[#allocation3 + $0x210] sm:$0xff]  ;;  %v1671_v33 = vld [vmem:[#allocation3 + $0x2c0] sm:$0xff]  ;;  %v3872_v36 = vpack.c.bf16 %v1674_v19, %v1666_v18 }
0x15dd   :  { %v1988_v18 = vld [vmem:[#allocation3 + $0x300] sm:$0xff] }
0x15de   :  { %v1052_v43 = vsel %vm1051_vm7, %v1050_v35, %v1049_v40  ;;  %v1354_v35 = vrot.slane %v4710_v30, 3  ;;  %v1352_v40 = vrot.slane %v4713_v31, 4  ;;  %v1996_v19 = vld [vmem:[#allocation3 + $0x340] sm:$0xff] }
0x15df   :  { %v1055_v53 = vsel %vm1054_vm9, %v1053_v48, %v1052_v43  ;;  %v977_v43 = vld [vmem:[#allocation3 + $0x60] sm:$0xff]  ;;  %v971_v48 = vld [vmem:[#allocation3 + $0x30] sm:$0xff] }
0x15e0   :  { %v1353_v44 = vsel %vm1048_vm8, %v1352_v40, %v1351_v34  ;;  %v3846_v56 = vpack.c.bf16 %v977_v43, %v969_v42  ;;  %v1687_v42 = vrot.slane %v4710_v30, 5  ;;  %v1660_v43 = vld [vmem:[#allocation3 + $0x268] sm:$0xff] }
0x163c   :  { %v953_v27 = vpop.permute.xlu0 %952 }
0x163d   :  { %956 = vst.msk [vmem:[#allocation2 + $0x1c] sm:$0xf] %vm192_vm3, %v953_v27  ;;  %v991_v27 = vld [vmem:[#allocation3 + $0xd0] sm:$0xff] }
0x163e   :  { %v3842_v13 = vpack.c.bf16 %v991_v27, %v983_v26  ;;  %v3862_v26 = vpack.c.bf16 %v1655_v8, %v1647_v4  ;;  %v1989_v4 = vld [vmem:[#allocation3 + $0x308] sm:$0xff] }
0x1644   :  { %v4725_v46 = vld [vmem:[#allocation2 + $0x1c] sm:$0xf] }
0x1645   :  { %v1056_v47 = vrot.slane %v4725_v46, 2  ;;  %v1358_v51 = vrot.slane %v4725_v46, 1 }
0x1647   :  { %v1058_v58 = vsel %vm1057_vm10, %v1056_v47, %v1055_v53  ;;  %v979_v47 = vld [vmem:[#allocation3 + $0x70] sm:$0xff]  ;;  %v988_v53 = vld [vmem:[#allocation3 + $0xb8] sm:$0xff] }
0x1648   :  { %3251 = vmatmul.mubr.msk.f32.vlgmr.msra.gmra.mrb[8].mxu0 %vm1059_vm11, %v1058_v58  ;;  %3252 = vmatmul.mubr.msk.f32.vlgmr.msra.gmra.mrb[8].mxu1 %vm1059_vm11, %v1058_v58  ;;  %v3854_v5 = vpack.c.bf16 %v979_v47, %v971_v48  ;;  %v3866_v48 = vpack.c.bf16 %v1671_v33, %v1663_v32  ;;  %v3874_v47 = vpack.c.bf16 %v1673_v39, %v1665_v38  ;;  %v2005_v32 = vld [vmem:[#allocation3 + $0x388] sm:$0xff]  ;;  %v2007_v33 = vld [vmem:[#allocation3 + $0x398] sm:$0xff]  ;;  %v2004_v39 = vld [vmem:[#allocation3 + $0x380] sm:$0xff] }
0x1649   :  { %3815 = vmatpush1.bf16.msra.mxu0 %v3814_v49  ;;  %3823 = vmatpush1.bf16.msra.mxu1 %v3822_v50  ;;  %v986_v49 = vld [vmem:[#allocation3 + $0xa8] sm:$0xff]  ;;  %v1355_v50 = vsel %vm1051_vm7, %v1354_v35, %v1353_v44  ;;  %v1654_v44 = vld [vmem:[#allocation3 + $0x238] sm:$0xff] }
0x164a   :  { %3817 = vmatprep.subr.bf16.mxu0 %v3816_v54  ;;  %3825 = vmatprep.subr.bf16.mxu1 %v3824_v55  ;;  %v996_v54 = vld [vmem:[#allocation3 + $0xf8] sm:$0xff]  ;;  %v1356_v55 = vrot.slane %v4721_v37, 2  ;;  %v3848_v59 = vpack.c.bf16 %v994_v52, %v986_v49  ;;  %v1651_v49 = vld [vmem:[#allocation3 + $0x220] sm:$0xff] }
0x164b   :  { %1268 = vmatprep.mubr.f32.mxu0 %v4384_v1  ;;  %1339 = vmatprep.mubr.f32.mxu1 %v4384_v1  ;;  %v3856_v60 = vpack.c.bf16 %v996_v54, %v988_v53  ;;  %v1653_v54 = vld [vmem:[#allocation3 + $0x230] sm:$0xff] }
0x164c   :  { %v1357_v6 = vsel %vm1054_vm9, %v1356_v55, %v1355_v50  ;;  %v1659_v50 = vld [vmem:[#allocation3 + $0x260] sm:$0xff]  ;;  %v1661_v55 = vld [vmem:[#allocation3 + $0x270] sm:$0xff] }
0x164d   :  { %3819 = vmatpush1.bf16.msra.mxu0 %v3818_v28  ;;  %3827 = vmatpush1.bf16.msra.mxu1 %v3826_v7  ;;  %v987_v28 = vld [vmem:[#allocation3 + $0xb0] sm:$0xff]  ;;  %v1359_v10 = vsel %vm1057_vm10, %v1358_v51, %v1357_v6  ;;  %v1670_v6 = vld [vmem:[#allocation3 + $0x2b8] sm:$0xff] }
0x164e   :  { %3829 = vmatprep.subr.bf16.mxu0 %v3828_v62  ;;  %3837 = vmatprep.subr.bf16.mxu1 %v3836_v63  ;;  %v995_v7 = vld [vmem:[#allocation3 + $0xf0] sm:$0xff]  ;;  %v1650_v62 = vld [vmem:[#allocation3 + $0x218] sm:$0xff] }
0x164f   :  { %v1658_v63 = vld [vmem:[#allocation3 + $0x258] sm:$0xff]  ;;  %v3858_v3 = vpack.c.bf16 %v995_v7, %v987_v28  ;;  %v3878_v28 = vpack.c.bf16 %v1659_v50, %v1651_v49  ;;  %v3886_v7 = vpack.c.bf16 %v1661_v55, %v1653_v54  ;;  %v2026_v50 = vrot.slane %v4713_v31, 7  ;;  %v2000_v54 = vld [vmem:[#allocation3 + $0x360] sm:$0xff] }
0x1650   :  { %3253 = vmatmul.mubr.msk.f32.vlgmr.msra.gmra.mrb[10].mxu0 %vm1059_vm11, %v1058_v58  ;;  %3254 = vmatmul.mubr.msk.f32.vlgmr.msra.gmra.mrb[10].mxu1 %vm1059_vm11, %v1058_v58  ;;  %v993_v58 = vld [vmem:[#allocation3 + $0xe0] sm:$0xff]  ;;  %v3868_v12 = vpack.c.bf16 %v1658_v63, %v1650_v62  ;;  %v2003_v49 = vld [vmem:[#allocation3 + $0x378] sm:$0xff] }
0x1651   :  { %3831 = vmatpush1.bf16.msra.mxu0 %v3830_v15  ;;  %3839 = vmatpush1.bf16.msra.mxu1 %v3838_v16  ;;  %v3850_v2 = vpack.c.bf16 %v993_v58, %v985_v57  ;;  %v1657_v15 = vld [vmem:[#allocation3 + $0x250] sm:$0xff]  ;;  %v1664_v16 = vld [vmem:[#allocation3 + $0x288] sm:$0xff]  ;;  %v1691_v57 = vrot.slane %v4725_v46, 3 }
0x1652   :  { %3833 = vmatprep.subr.bf16.mxu0 %v3832_v24  ;;  %3841 = vmatprep.subr.bf16.mxu1 %v3840_v25  ;;  %v1679_v24 = vrot.slane %v4701_v21, 2  ;;  %v1683_v25 = vrot.slane %v4703_v22, 7  ;;  %v3870_v27 = vpack.c.bf16 %v1657_v15, %v1649_v14  ;;  %v3864_v35 = vpack.c.bf16 %v1672_v17, %v1664_v16  ;;  %v1676_v58 = vld [vmem:[#allocation3 + $0x2e8] sm:$0xff] }
0x1653   :  { %1426 = vmatprep.mubr.f32.mxu0 %v4384_v1  ;;  %1497 = vmatprep.mubr.f32.mxu1 %v4384_v1  ;;  %v2021_v14 = vrot.slane %v4705_v23, 2  ;;  %v2023_v15 = vrot.slane %v4699_v20, 1  ;;  %v1998_v23 = vld [vmem:[#allocation3 + $0x350] sm:$0xff] }
0x1654   :  { %v1681_v34 = vsel %vm1039_vm4, %v1680_v9, %v1679_v24  ;;  %v1997_v9 = vld [vmem:[#allocation3 + $0x348] sm:$0xff]  ;;  %v2020_v24 = vrot.slane %v4701_v21, 3  ;;  %v3894_v21 = vpack.c.bf16 %v1996_v19, %v1988_v18  ;;  %v2546_v19 = vld [vmem:[#allocation8 + $0x100] sm:$0xff] }
0x1655   :  { %3835 = vmatpush1.bf16.msra.mxu0 %v3834_v41  ;;  %3843 = vmatpush1.bf16.msra.mxu1 %v3842_v13  ;;  %v1682_v40 = vsel %vm1042_vm5, %v4699_v20, %v1681_v34  ;;  %v1652_v41 = vld [vmem:[#allocation3 + $0x228] sm:$0xff]  ;;  %v2015_v34 = vld [vmem:[#allocation3 + $0x3d8] sm:$0xff] }
0x1656   :  { %3845 = vmatprep.subr.bf16.mxu0 %v3844_v45  ;;  %3853 = vmatprep.subr.bf16.mxu1 %v3852_v29  ;;  %v1684_v13 = vsel %vm1045_vm6, %v1683_v25, %v1682_v40  ;;  %v1662_v45 = vld [vmem:[#allocation3 + $0x278] sm:$0xff]  ;;  %v1685_v29 = vrot.slane %v4713_v31, 6  ;;  %v3876_v52 = vpack.c.bf16 %v1660_v43, %v1652_v41  ;;  %v3892_v25 = vpack.c.bf16 %v1997_v9, %v1989_v4  ;;  %v2013_v20 = vld [vmem:[#allocation3 + $0x3c8] sm:$0xff]  ;;  %v2012_v40 = vld [vmem:[#allocation3 + $0x3c0] sm:$0xff] }
0x1657   :  { %v3884_v53 = vpack.c.bf16 %v1662_v45, %v1654_v44  ;;  %v3896_v41 = vpack.c.bf16 %v2013_v20, %v2005_v32  ;;  %v2014_v43 = vld [vmem:[#allocation3 + $0x3d0] sm:$0xff]  ;;  %v1993_v44 = vld [vmem:[#allocation3 + $0x328] sm:$0xff] }
0x1658   :  { %3255 = vmatmul.mubr.msk.f32.vlgmr.msra.gmra.mrb[8].mxu0 %vm1059_vm11, %v1359_v10  ;;  %3256 = vmatmul.mubr.msk.f32.vlgmr.msra.gmra.mrb[8].mxu1 %vm1059_vm11, %v1359_v10  ;;  %v1686_v51 = vsel %vm1048_vm8, %v1685_v29, %v1684_v13  ;;  %v3904_v13 = vpack.c.bf16 %v2015_v34, %v2007_v33  ;;  %v2028_v29 = vrot.slane %v4710_v30, 6  ;;  %v2018_v4 = vld [vmem:[#allocation3 + $0x3f0] sm:$0xff]  ;;  %v2531_v9 = vld [vmem:[#allocation8 + $0x88] sm:$0xff]  ;;  %v2517_v34 = vld [vmem:[#allocation8 + $0x18] sm:$0xff] }
0x1659   :  { %3847 = vmatpush1.bf16.msra.mxu0 %v3846_v56  ;;  %3855 = vmatpush1.bf16.msra.mxu1 %v3854_v5  ;;  %v1668_v56 = vld [vmem:[#allocation3 + $0x2a8] sm:$0xff]  ;;  %v1688_v5 = vsel %vm1051_vm7, %v1687_v42, %v1686_v51  ;;  %v2006_v42 = vld [vmem:[#allocation3 + $0x390] sm:$0xff]  ;;  %v3898_v51 = vpack.c.bf16 %v2012_v40, %v2004_v39  ;;  %v2534_v39 = vld [vmem:[#allocation8 + $0xa0] sm:$0xff] }
0x165a   :  { %3849 = vmatprep.subr.bf16.mxu0 %v3848_v59  ;;  %3857 = vmatprep.subr.bf16.mxu1 %v3856_v60  ;;  %v1678_v59 = vld [vmem:[#allocation3 + $0x2f8] sm:$0xff]  ;;  %v1689_v60 = vrot.slane %v4721_v37, 4  ;;  %v3880_v62 = vpack.c.bf16 %v1676_v58, %v1668_v56  ;;  %v1994_v56 = vld [vmem:[#allocation3 + $0x330] sm:$0xff]  ;;  %v2032_v58 = vrot.slane %v4725_v46, 4  ;;  %v2530_v46 = vld [vmem:[#allocation8 + $0x80] sm:$0xff] }
0x165b   :  { %1568 = vmatprep.mubr.f32.mxu0 %v4384_v1  ;;  %1639 = vmatprep.mubr.f32.mxu1 %v4384_v1  ;;  %v3888_v63 = vpack.c.bf16 %v1678_v59, %v1670_v6  ;;  %v2017_v6 = vld [vmem:[#allocation3 + $0x3e8] sm:$0xff]  ;;  %v2011_v59 = vld [vmem:[#allocation3 + $0x3b8] sm:$0xff]  ;;  %v2516_v33 = vld [vmem:[#allocation8 + $0x10] sm:$0xff] }
0x165c   :  { %v1690_v61 = vsel %vm1054_vm9, %v1689_v60, %v1688_v5  ;;  %v2002_v5 = vld [vmem:[#allocation3 + $0x370] sm:$0xff]  ;;  %v2019_v60 = vld [vmem:[#allocation3 + $0x3f8] sm:$0xff]  ;;  %v2535_v40 = vld [vmem:[#allocation8 + $0xa8] sm:$0xff] }
0x165d   :  { %3851 = vmatpush1.bf16.msra.mxu0 %v3850_v2  ;;  %3859 = vmatpush1.bf16.msra.mxu1 %v3858_v3  ;;  %v1669_v2 = vld [vmem:[#allocation3 + $0x2b0] sm:$0xff]  ;;  %v1692_v8 = vsel %vm1057_vm10, %v1691_v57, %v1690_v61  ;;  %v2009_v57 = vld [vmem:[#allocation3 + $0x3a8] sm:$0xff]  ;;  %v2016_v61 = vld [vmem:[#allocation3 + $0x3e0] sm:$0xff] }
0x165e   :  { %3861 = vmatprep.subr.bf16.mxu0 %v3860_v11  ;;  %3869 = vmatprep.subr.bf16.mxu1 %v3868_v12  ;;  %v1677_v3 = vld [vmem:[#allocation3 + $0x2f0] sm:$0xff]  ;;  %v1991_v11 = vld [vmem:[#allocation3 + $0x318] sm:$0xff] }
0x165f   :  { %v1999_v12 = vld [vmem:[#allocation3 + $0x358] sm:$0xff]  ;;  %v3890_v17 = vpack.c.bf16 %v1677_v3, %v1669_v2  ;;  %v3920_v2 = vpack.c.bf16 %v2019_v60, %v2011_v59  ;;  %v2010_v3 = vld [vmem:[#allocation3 + $0x3b0] sm:$0xff]  ;;  %v2571_v59 = vld [vmem:[#allocation8 + $0x1c8] sm:$0xff] }
0x1660   :  { %3257 = vmatmul.mubr.msk.f32.vlgmr.msra.gmra.mrb[10].mxu0 %vm1059_vm11, %v1359_v10  ;;  %3258 = vmatmul.mubr.msk.f32.vlgmr.msra.gmra.mrb[10].mxu1 %vm1059_vm11, %v1359_v10  ;;  %v1675_v10 = vld [vmem:[#allocation3 + $0x2e0] sm:$0xff] }
0x1661   :  { %3863 = vmatpush1.bf16.msra.mxu0 %v3862_v26  ;;  %3871 = vmatpush1.bf16.msra.mxu1 %v3870_v27  ;;  %v3882_v16 = vpack.c.bf16 %v1675_v10, %v1667_v0  ;;  %v3900_v26 = vpack.c.bf16 %v1999_v12, %v1991_v11  ;;  %v1990_v27 = vld [vmem:[#allocation3 + $0x310] sm:$0xff]  ;;  %v3918_v0 = vpack.c.bf16 %v2002_v5, %v1994_v56  ;;  %v2008_v10 = vld [vmem:[#allocation3 + $0x3a0] sm:$0xff] }
0x1662   :  { %3865 = vmatprep.subr.bf16.mxu0 %v3864_v35  ;;  %3873 = vmatprep.subr.bf16.mxu1 %v3872_v36  ;;  %v2022_v35 = vsel %vm1039_vm4, %v2021_v14, %v2020_v24  ;;  %v3902_v38 = vpack.c.bf16 %v1998_v23, %v1990_v27  ;;  %v2562_v11 = vld [vmem:[#allocation8 + $0x180] sm:$0xff]  ;;  %v3914_v12 = vpack.c.bf16 %v2016_v61, %v2008_v10  ;;  %v2547_v24 = vld [vmem:[#allocation8 + $0x108] sm:$0xff]  ;;  %v2564_v27 = vld [vmem:[#allocation8 + $0x190] sm:$0xff] }
0x1663   :  { %1759 = vmatprep.mubr.f32.mxu0 %v4384_v1  ;;  %1830 = vmatprep.mubr.f32.mxu1 %v4384_v1  ;;  %v2024_v36 = vsel %vm1042_vm5, %v2023_v15, %v2022_v35  ;;  %v3922_v14 = vpack.c.bf16 %v2018_v4, %v2010_v3  ;;  %v2514_v15 = vld [vmem:[#allocation8] sm:$0xff]  ;;  %v2565_v23 = vld [vmem:[#allocation8 + $0x198] sm:$0xff]  ;;  %v3958_v20 = vpack.c.bf16 %v2547_v24, %v2546_v19  ;;  %v2552_v5 = vld [vmem:[#allocation8 + $0x130] sm:$0xff] }
0x1664   :  { %v2025_v45 = vsel %vm1045_vm6, %v4703_v22, %v2024_v36  ;;  %v3960_v36 = vpack.c.bf16 %v2565_v23, %v2564_v27  ;;  %v2541_v3 = vld [vmem:[#allocation8 + $0xd8] sm:$0xff]  ;;  %v2572_v4 = vld [vmem:[#allocation8 + $0x1d0] sm:$0xff]  ;;  %v2574_v19 = vld [vmem:[#allocation8 + $0x1e0] sm:$0xff] }
0x1665   :  { %3867 = vmatpush1.bf16.msra.mxu0 %v3866_v48  ;;  %3875 = vmatpush1.bf16.msra.mxu1 %v3874_v47  ;;  %v2001_v48 = vld [vmem:[#allocation3 + $0x368] sm:$0xff]  ;;  %v1995_v47 = vld [vmem:[#allocation3 + $0x338] sm:$0xff]  ;;  %v2027_v22 = vsel %vm1048_vm8, %v2026_v50, %v2025_v45  ;;  %v3932_v45 = vpack.c.bf16 %v2535_v40, %v2534_v39  ;;  %v2526_v27 = vld [vmem:[#allocation8 + $0x60] sm:$0xff] }
0x1666   :  { %3877 = vmatprep.subr.bf16.mxu0 %v3876_v52  ;;  %3885 = vmatprep.subr.bf16.mxu1 %v3884_v53  ;;  %v3906_v52 = vpack.c.bf16 %v2014_v43, %v2006_v42  ;;  %v1992_v53 = vld [vmem:[#allocation3 + $0x320] sm:$0xff]  ;;  %v3908_v30 = vpack.c.bf16 %v2001_v48, %v1993_v44  ;;  %v3916_v55 = vpack.c.bf16 %v2003_v49, %v1995_v47  ;;  %v2519_v44 = vld [vmem:[#allocation8 + $0x28] sm:$0xff]  ;;  %v2536_v49 = vld [vmem:[#allocation8 + $0xb0] sm:$0xff] }
0x1667   :  { %v2029_v31 = vsel %vm1051_vm7, %v2028_v29, %v2027_v22  ;;  %v2518_v43 = vld [vmem:[#allocation8 + $0x20] sm:$0xff]  ;;  %v2551_v47 = vld [vmem:[#allocation8 + $0x128] sm:$0xff]  ;;  %v2537_v50 = vld [vmem:[#allocation8 + $0xb8] sm:$0xff] }
0x1668   :  { %3259 = vmatmul.mubr.msk.f32.vlgmr.msra.gmra.mrb[8].mxu0 %vm1059_vm11, %v1692_v8  ;;  %3260 = vmatmul.mubr.msk.f32.vlgmr.msra.gmra.mrb[8].mxu1 %vm1059_vm11, %v1692_v8  ;;  %v2550_v48 = vld [vmem:[#allocation8 + $0x120] sm:$0xff]  ;;  %v2520_v22 = vld [vmem:[#allocation8 + $0x30] sm:$0xff]  ;;  %v2575_v24 = vld [vmem:[#allocation8 + $0x1e8] sm:$0xff] }
0x1669   :  { %3879 = vmatpush1.bf16.msra.mxu0 %v3878_v28  ;;  %3887 = vmatpush1.bf16.msra.mxu1 %v3886_v7  ;;  %v2030_v28 = vrot.slane %v4721_v37, 5  ;;  %v3910_v7 = vpack.c.bf16 %v2000_v54, %v1992_v53  ;;  %v2563_v37 = vld [vmem:[#allocation8 + $0x188] sm:$0xff]  ;;  %v3934_v53 = vpack.c.bf16 %v2519_v44, %v2518_v43  ;;  %v3966_v54 = vpack.c.bf16 %v2551_v47, %v2550_v48  ;;  %v2576_v40 = vld [vmem:[#allocation8 + $0x1f0] sm:$0xff]  ;;  %v2561_v44 = vld [vmem:[#allocation8 + $0x178] sm:$0xff] }
0x166a   :  { %3881 = vmatprep.subr.bf16.mxu0 %v3880_v62  ;;  %3889 = vmatprep.subr.bf16.mxu1 %v3888_v63  ;;  %v3912_v63 = vpack.c.bf16 %v2017_v6, %v2009_v57  ;;  %v3956_v18 = vpack.c.bf16 %v2563_v37, %v2562_v11  ;;  %v2553_v57 = vld [vmem:[#allocation8 + $0x138] sm:$0xff]  ;;  %v2570_v6 = vld [vmem:[#allocation8 + $0x1c0] sm:$0xff]  ;;  %v2524_v11 = vld [vmem:[#allocation8 + $0x50] sm:$0xff] }
0x166b   :  { %1901 = vmatprep.mubr.f32.mxu0 %v4384_v1  ;;  %1972 = vmatprep.mubr.f32.mxu1 %v4384_v1  ;;  %v2031_v62 = vsel %vm1054_vm9, %v2030_v28, %v2029_v31  ;;  %v2538_v31 = vld [vmem:[#allocation8 + $0xc0] sm:$0xff]  ;;  %v3970_v28 = vpack.c.bf16 %v2553_v57, %v2552_v5  ;;  %v3972_v61 = vpack.c.bf16 %v2571_v59, %v2570_v6  ;;  %v2525_v37 = vld [vmem:[#allocation8 + $0x58] sm:$0xff]  ;;  %v2560_v43 = vld [vmem:[#allocation8 + $0x170] sm:$0xff] }
0x166c   :  { %v2594_v48 = vld [vmem:[#allocation8 + $0x280] sm:$0xff]  ;;  %v2595_v47 = vld [vmem:[#allocation8 + $0x288] sm:$0xff] }
0x166d   :  { %3883 = vmatpush1.bf16.msra.mxu0 %v3882_v16  ;;  %3891 = vmatpush1.bf16.msra.mxu1 %v3890_v17  ;;  %v2515_v16 = vld [vmem:[#allocation8 + $0x8] sm:$0xff]  ;;  %v3924_v17 = vpack.c.bf16 %v2531_v9, %v2530_v46  ;;  %v2573_v46 = vld [vmem:[#allocation8 + $0x1d8] sm:$0xff]  ;;  %v2578_v57 = vld [vmem:[#allocation8 + $0x200] sm:$0xff] }
0x166e   :  { %3893 = vmatprep.subr.bf16.mxu0 %v3892_v25  ;;  %3901 = vmatprep.subr.bf16.mxu1 %v3900_v26  ;;  %v2532_v25 = vld [vmem:[#allocation8 + $0x90] sm:$0xff]  ;;  %v2533_v26 = vld [vmem:[#allocation8 + $0x98] sm:$0xff]  ;;  %v3926_v32 = vpack.c.bf16 %v2515_v16, %v2514_v15  ;;  %v2579_v6 = vld [vmem:[#allocation8 + $0x208] sm:$0xff] }
0x166f   :  { %v3928_v35 = vpack.c.bf16 %v2533_v26, %v2532_v25  ;;  %v2556_v15 = vld [vmem:[#allocation8 + $0x150] sm:$0xff]  ;;  %v2557_v16 = vld [vmem:[#allocation8 + $0x158] sm:$0xff]  ;;  %v3946_v25 = vpack.c.bf16 %v2525_v37, %v2524_v11  ;;  %v2610_v59 = vld [vmem:[#allocation8 + $0x300] sm:$0xff] }
0x1670   :  { %3261 = vmatmul.mubr.msk.f32.vlgmr.msra.gmra.mrb[10].mxu0 %vm1059_vm11, %v1692_v8  ;;  %3262 = vmatmul.mubr.msk.f32.vlgmr.msra.gmra.mrb[10].mxu1 %vm1059_vm11, %v1692_v8  ;;  %v2033_v8 = vsel %vm1057_vm10, %v2032_v58, %v2031_v62  ;;  %v2539_v58 = vld [vmem:[#allocation8 + $0xc8] sm:$0xff]  ;;  %v2554_v62 = vld [vmem:[#allocation8 + $0x140] sm:$0xff]  ;;  %v3978_v26 = vpack.c.bf16 %v2557_v16, %v2556_v15  ;;  %v2581_v15 = vld [vmem:[#allocation8 + $0x218] sm:$0xff] }
0x1671   :  { %3895 = vmatpush1.bf16.msra.mxu0 %v3894_v21  ;;  %3903 = vmatpush1.bf16.msra.mxu1 %v3902_v38  ;;  %v2548_v21 = vld [vmem:[#allocation8 + $0x110] sm:$0xff]  ;;  %v2549_v38 = vld [vmem:[#allocation8 + $0x118] sm:$0xff]  ;;  %v3940_v10 = vpack.c.bf16 %v2539_v58, %v2538_v31 }
0x1672   :  { %3897 = vmatprep.subr.bf16.mxu0 %v3896_v41  ;;  %3905 = vmatprep.subr.bf16.mxu1 %v3904_v13  ;;  %v2566_v41 = vld [vmem:[#allocation8 + $0x1a0] sm:$0xff]  ;;  %v2567_v13 = vld [vmem:[#allocation8 + $0x1a8] sm:$0xff]  ;;  %v3962_v42 = vpack.c.bf16 %v2549_v38, %v2548_v21  ;;  %v2544_v21 = vld [vmem:[#allocation8 + $0xf0] sm:$0xff] }
0x1673   :  { %2100 = vmatprep.mubr.f32.mxu0 %v4384_v1  ;;  %2171 = vmatprep.mubr.f32.mxu1 %v4384_v1  ;;  %v3964_v29 = vpack.c.bf16 %v2567_v13, %v2566_v41  ;;  %v2545_v38 = vld [vmem:[#allocation8 + $0xf8] sm:$0xff]  ;;  %v2528_v13 = vld [vmem:[#allocation8 + $0x70] sm:$0xff] }
0x1674   :  { %v3952_v39 = vpack.c.bf16 %v2545_v38, %v2544_v21  ;;  %v2577_v41 = vld [vmem:[#allocation8 + $0x1f8] sm:$0xff]  ;;  %v2583_v21 = vld [vmem:[#allocation8 + $0x228] sm:$0xff] }
0x1675   :  { %3899 = vmatpush1.bf16.msra.mxu0 %v3898_v51  ;;  %3907 = vmatpush1.bf16.msra.mxu1 %v3906_v52  ;;  %v2568_v51 = vld [vmem:[#allocation8 + $0x1b0] sm:$0xff]  ;;  %v2569_v52 = vld [vmem:[#allocation8 + $0x1b8] sm:$0xff] }
0x1676   :  { %3909 = vmatprep.subr.bf16.mxu0 %v3908_v30  ;;  %3917 = vmatprep.subr.bf16.mxu1 %v3916_v55  ;;  %v2521_v30 = vld [vmem:[#allocation8 + $0x38] sm:$0xff]  ;;  %v3936_v55 = vpack.c.bf16 %v2537_v50, %v2536_v49  ;;  %v3968_v56 = vpack.c.bf16 %v2569_v52, %v2568_v51  ;;  %v2626_v49 = vld [vmem:[#allocation8 + $0x380] sm:$0xff]  ;;  %v3988_v50 = vpack.c.bf16 %v2595_v47, %v2594_v48  ;;  %v2627_v51 = vld [vmem:[#allocation8 + $0x388] sm:$0xff] }
0x1677   :  { %v3938_v60 = vpack.c.bf16 %v2521_v30, %v2520_v22  ;;  %v4020_v52 = vpack.c.bf16 %v2627_v51, %v2626_v49 }
0x1678   :  { %3263 = vmatmul.mubr.msk.f32.vlgmr.msra.gmra.mrb[8].mxu0 %vm1059_vm11, %v2033_v8  ;;  %3264 = vmatmul.mubr.msk.f32.vlgmr.msra.gmra.mrb[8].mxu1 %vm1059_vm11, %v2033_v8 }
0x1679   :  { %3911 = vmatpush1.bf16.msra.mxu0 %v3910_v7  ;;  %3919 = vmatpush1.bf16.msra.mxu1 %v3918_v0  ;;  %v2522_v7 = vld [vmem:[#allocation8 + $0x40] sm:$0xff]  ;;  %v2523_v0 = vld [vmem:[#allocation8 + $0x48] sm:$0xff] }
0x167a   :  { %3913 = vmatprep.subr.bf16.mxu0 %v3912_v63  ;;  %3921 = vmatprep.subr.bf16.mxu1 %v3920_v2  ;;  %v2555_v63 = vld [vmem:[#allocation8 + $0x148] sm:$0xff]  ;;  %v2540_v2 = vld [vmem:[#allocation8 + $0xd0] sm:$0xff] }
0x167b   :  { %2242 = vmatprep.mubr.f32.mxu0 %v4384_v1  ;;  %2313 = vmatprep.mubr.f32.mxu1 %v4384_v1  ;;  %v3930_v1 = vpack.c.bf16 %v2517_v34, %v2516_v33  ;;  %v3974_v9 = vpack.c.bf16 %v2555_v63, %v2554_v62  ;;  %v2558_v33 = vld [vmem:[#allocation8 + $0x160] sm:$0xff]  ;;  %v2559_v34 = vld [vmem:[#allocation8 + $0x168] sm:$0xff]  ;;  %v2597_v62 = vld [vmem:[#allocation8 + $0x298] sm:$0xff] }
0x167c   :  { %v2628_v63 = vld [vmem:[#allocation8 + $0x390] sm:$0xff] }
0x167d   :  { %3915 = vmatpush1.bf16.msra.mxu0 %v3914_v12  ;;  %3923 = vmatpush1.bf16.msra.mxu1 %v3922_v14  ;;  %v3944_v12 = vpack.c.bf16 %v2541_v3, %v2540_v2  ;;  %v3976_v14 = vpack.c.bf16 %v2573_v46, %v2572_v4  ;;  %v2629_v2 = vld [vmem:[#allocation8 + $0x398] sm:$0xff]  ;;  %v3990_v46 = vpack.c.bf16 %v2579_v6, %v2578_v57  ;;  %v2602_v57 = vld [vmem:[#allocation8 + $0x2c0] sm:$0xff]  ;;  %v2635_v6 = vld [vmem:[#allocation8 + $0x3c8] sm:$0xff] }
0x167e   :  { %3925 = vmatprep.subr.bf16.mxu0 %v3924_v17  ;;  %3957 = vmatprep.subr.bf16.mxu1 %v3956_v18  ;;  %v2542_v17 = vld [vmem:[#allocation8 + $0xe0] sm:$0xff]  ;;  %v2543_v18 = vld [vmem:[#allocation8 + $0xe8] sm:$0xff] }
0x167f   :  { %v3948_v23 = vpack.c.bf16 %v2543_v18, %v2542_v17 }
0x1680   :  { %3265 = vmatmul.mubr.msk.f32.vlgmr.msra.gmra.mrb[10].mxu0 %vm1059_vm11, %v2033_v8  ;;  %3266 = vmatmul.mubr.msk.f32.vlgmr.msra.gmra.mrb[10].mxu1 %vm1059_vm11, %v2033_v8  ;;  %v3942_v8 = vpack.c.bf16 %v2523_v0, %v2522_v7  ;;  %v2596_v0 = vld [vmem:[#allocation8 + $0x290] sm:$0xff] }
0x1681   :  { %3927 = vmatpush3.bf16.msra.mxu0 %v3926_v32  ;;  %3959 = vmatpush3.bf16.msra.mxu1 %v3958_v20  ;;  %v3980_v32 = vpack.c.bf16 %v2575_v24, %v2574_v19  ;;  %v2527_v20 = vld [vmem:[#allocation8 + $0x68] sm:$0xff]  ;;  %v3992_v18 = vpack.c.bf16 %v2597_v62, %v2596_v0  ;;  %v4024_v19 = vpack.c.bf16 %v2629_v2, %v2628_v63  ;;  %v2612_v24 = vld [vmem:[#allocation8 + $0x310] sm:$0xff]  ;;  %v2605_v2 = vld [vmem:[#allocation8 + $0x2d8] sm:$0xff] }
0x1682   :  { %3929 = vmatprep.subr.bf16.mxu0 %v3928_v35  ;;  %3961 = vmatprep.subr.bf16.mxu1 %v3960_v36  ;;  %v3950_v35 = vpack.c.bf16 %v2527_v20, %v2526_v27  ;;  %v3982_v36 = vpack.c.bf16 %v2559_v34, %v2558_v33  ;;  %v2599_v27 = vld [vmem:[#allocation8 + $0x2a8] sm:$0xff]  ;;  %v2604_v63 = vld [vmem:[#allocation8 + $0x2d0] sm:$0xff] }
0x1683   :  { %v2619_v62 = vld [vmem:[#allocation8 + $0x348] sm:$0xff] }
0x1685   :  { %3931 = vmatpush3.bf16.msra.mxu0 %v3930_v1  ;;  %3963 = vmatpush3.bf16.msra.mxu1 %v3962_v42  ;;  %v3984_v1 = vpack.c.bf16 %v2577_v41, %v2576_v40  ;;  %v2529_v42 = vld [vmem:[#allocation8 + $0x78] sm:$0xff]  ;;  %v2614_v40 = vld [vmem:[#allocation8 + $0x320] sm:$0xff]  ;;  %v2615_v41 = vld [vmem:[#allocation8 + $0x328] sm:$0xff] }
0x1686   :  { %3933 = vmatprep.subr.bf16.mxu0 %v3932_v45  ;;  %3965 = vmatprep.subr.bf16.mxu1 %v3964_v29  ;;  %v3954_v45 = vpack.c.bf16 %v2529_v42, %v2528_v13  ;;  %v3986_v29 = vpack.c.bf16 %v2561_v44, %v2560_v43  ;;  %v2600_v13 = vld [vmem:[#allocation8 + $0x2b0] sm:$0xff]  ;;  %v2601_v43 = vld [vmem:[#allocation8 + $0x2b8] sm:$0xff]  ;;  %v4030_v51 = vpack.c.bf16 %v2615_v41, %v2614_v40 }
0x1687   :  { %v2632_v44 = vld [vmem:[#allocation8 + $0x3b0] sm:$0xff] }
0x1688   :  { %v2592_v41 = vld [vmem:[#allocation8 + $0x270] sm:$0xff] }
0x1689   :  { %3935 = vmatpush3.bf16.msra.mxu0 %v3934_v53  ;;  %3967 = vmatpush3.bf16.msra.mxu1 %v3966_v54  ;;  %v2330_v53 = vlaneseq }
0x168a   :  { %3937 = vmatprep.subr.bf16.mxu0 %v3936_v55  ;;  %3969 = vmatprep.subr.bf16.mxu1 %v3968_v56  ;;  %v4813_v55 = vld [vmem:[%s4879_s5] sm:$0xff] }
0x168b   :  { %v4806_v54 = vshrl.u32 %v2330_v53, 7  ;;  %v2585_v53 = vld [vmem:[#allocation8 + $0x238] sm:$0xff] }
0x168d   :  { %3939 = vmatpush3.bf16.msra.mxu0 %v3938_v60  ;;  %3971 = vmatpush3.bf16.msra.mxu1 %v3970_v28  ;;  %v2336_v22 = vsub.s32 1, %v4806_v54  ;;  %v2344_v30 = vsub.s32 3, %v4806_v54  ;;  %v2332_v56 = vsub.s32 0, %v4806_v54  ;;  %v2340_v5 = vsub.s32 2, %v4806_v54  ;;  %v2611_v60 = vld [vmem:[#allocation8 + $0x308] sm:$0xff] }
0x168e   :  { %3941 = vmatprep.subr.bf16.mxu0 %v3940_v10  ;;  %3973 = vmatprep.subr.bf16.mxu1 %v3972_v61  ;;  %v2352_v37 = vsub.s32 5, %v4806_v54 }
0x168f   :  { %v2337_v31 = vrot.slane %v4813_v55, %v2336_v22  ;;  %v2345_v58 = vrot.slane %v4813_v55, %v2344_v30  ;;  %v2333_v28 = vrot.slane %v4813_v55, %v2332_v56  ;;  %v2341_v7 = vrot.slane %v4813_v55, %v2340_v5  ;;  %v2616_v56 = vld [vmem:[#allocation8 + $0x330] sm:$0xff]  ;;  %v2617_v5 = vld [vmem:[#allocation8 + $0x338] sm:$0xff] }
0x1690   :  { %v2353_v33 = vrot.slane %v4813_v55, %v2352_v37  ;;  %v4000_v22 = vpack.c.bf16 %v2601_v43, %v2600_v13  ;;  %v4008_v37 = vpack.c.bf16 %v2605_v2, %v2604_v63  ;;  %v2593_v13 = vld [vmem:[#allocation8 + $0x278] sm:$0xff]  ;;  %v2356_v43 = vsub.s32 6, %v4806_v54 }
0x1691   :  { %3943 = vmatpush3.bf16.msra.mxu0 %v3942_v8  ;;  %3975 = vmatpush3.bf16.msra.mxu1 %v3974_v9  ;;  %v4022_v8 = vpack.c.bf16 %v2611_v60, %v2610_v59  ;;  %v4034_v60 = vpack.c.bf16 %v2617_v5, %v2616_v56  ;;  %v2387_v56 = vld [vmem:[#allocation6 + $0x8] sm:$0xff]  ;;  %v2418_v5 = vld [vmem:[#allocation6 + $0x100] sm:$0xff] }
0x1692   :  { %3945 = vmatprep.subr.bf16.mxu0 %v3944_v12  ;;  %3977 = vmatprep.subr.bf16.mxu1 %v3976_v14  ;;  %v2360_v12 = vsub.s32 7, %v4806_v54  ;;  %v2580_v14 = vld [vmem:[#allocation8 + $0x210] sm:$0xff] }
0x1693   :  { %v3994_v20 = vpack.c.bf16 %v2581_v15, %v2580_v14  ;;  %v2620_v14 = vld [vmem:[#allocation8 + $0x350] sm:$0xff]  ;;  %v2621_v15 = vld [vmem:[#allocation8 + $0x358] sm:$0xff] }
0x1694   :  { %v2361_v34 = vrot.slane %v4813_v55, %v2360_v12 }
0x1695   :  { %3947 = vmatpush3.bf16.msra.mxu0 %v3946_v25  ;;  %3979 = vmatpush3.bf16.msra.mxu1 %v3978_v26  ;;  %v2613_v25 = vld [vmem:[#allocation8 + $0x318] sm:$0xff]  ;;  %v2598_v26 = vld [vmem:[#allocation8 + $0x2a0] sm:$0xff] }
0x1696   :  { %3949 = vmatprep.subr.bf16.mxu0 %v3948_v23  ;;  %3981 = vmatprep.subr.bf16.mxu1 %v3980_v32  ;;  %v2630_v23 = vld [vmem:[#allocation8 + $0x3a0] sm:$0xff]  ;;  %v2631_v32 = vld [vmem:[#allocation8 + $0x3a8] sm:$0xff]  ;;  %v3996_v38 = vpack.c.bf16 %v2599_v27, %v2598_v26 }
0x1697   :  { %v2590_v26 = vld [vmem:[#allocation8 + $0x260] sm:$0xff]  ;;  %v2591_v27 = vld [vmem:[#allocation8 + $0x268] sm:$0xff] }
0x1699   :  { %3951 = vmatpush3.bf16.msra.mxu0 %v3950_v35  ;;  %3983 = vmatpush3.bf16.msra.mxu1 %v3982_v36  ;;  %v4026_v35 = vpack.c.bf16 %v2613_v25, %v2612_v24  ;;  %v2582_v36 = vld [vmem:[#allocation8 + $0x220] sm:$0xff]  ;;  %v4042_v25 = vpack.c.bf16 %v2621_v15, %v2620_v14  ;;  %v2391_v15 = vld [vmem:[#allocation6 + $0x28] sm:$0xff] }
0x169a   :  { %3953 = vmatprep.subr.bf16.mxu0 %v3952_v39  ;;  %3985 = vmatprep.subr.bf16.mxu1 %v3984_v1  ;;  %v4028_v39 = vpack.c.bf16 %v2631_v32, %v2630_v23  ;;  %v3998_v47 = vpack.c.bf16 %v2583_v21, %v2582_v36  ;;  %v2640_v36 = vld [vmem:[#allocation8 + $0x3f0] sm:$0xff]  ;;  %v2641_v21 = vld [vmem:[#allocation8 + $0x3f8] sm:$0xff]  ;;  %v2390_v14 = vld [vmem:[#allocation6 + $0x20] sm:$0xff] }
0x169d   :  { %3955 = vmatpush3.bf16.msra.mxu0 %v3954_v45  ;;  %3987 = vmatpush3.bf16.msra.mxu1 %v3986_v29  ;;  %v2633_v45 = vld [vmem:[#allocation8 + $0x3b8] sm:$0xff] }
0x169e   :  { %3989 = vmatprep.subr.bf16.mxu0 %v3988_v50  ;;  %4021 = vmatprep.subr.bf16.mxu1 %v4020_v52  ;;  %v2584_v52 = vld [vmem:[#allocation8 + $0x230] sm:$0xff]  ;;  %v4032_v30 = vpack.c.bf16 %v2633_v45, %v2632_v44  ;;  %v4048_v45 = vpack.c.bf16 %v2641_v21, %v2640_v36  ;;  %v2425_v21 = vld [vmem:[#allocation6 + $0x138] sm:$0xff] }
0x169f   :  { %v4002_v59 = vpack.c.bf16 %v2585_v53, %v2584_v52  ;;  %v4018_v53 = vpack.c.bf16 %v2593_v13, %v2592_v41  ;;  %v2424_v36 = vld [vmem:[#allocation6 + $0x130] sm:$0xff]  ;;  %v2443_v41 = vld [vmem:[#allocation6 + $0x1c8] sm:$0xff] }
0x174b   :  { %v2102_v10 = vpop.f32.mrb[8].mxu0  ;;  %v2173_v61 = vpop.f32.mrb[8].mxu1 }
0x174c   :  { %v2104_v3 = vpop.f32.mrb[9].mxu0  ;;  %v2175_v4 = vpop.f32.mrb[9].mxu1  ;;  %v2370_v16 = vadd.f32 %v2333_v28, %v2102_v10  ;;  %v2372_v17 = vadd.f32 %v2341_v7, %v2173_v61  ;;  %v2586_v28 = vld [vmem:[#allocation8 + $0x240] sm:$0xff]  ;;  %v2587_v7 = vld [vmem:[#allocation8 + $0x248] sm:$0xff] }
0x174d   :  { %v2371_v9 = vadd.f32 %v2337_v31, %v2104_v3  ;;  %v2373_v11 = vadd.f32 %v2345_v58, %v2175_v4  ;;  %v2603_v31 = vld [vmem:[#allocation8 + $0x2c8] sm:$0xff]  ;;  %v2634_v58 = vld [vmem:[#allocation8 + $0x3c0] sm:$0xff]  ;;  %v2636_v3 = vld [vmem:[#allocation8 + $0x3d0] sm:$0xff] }
0x174e   :  { %v4004_v0 = vpack.c.bf16 %v2603_v31, %v2602_v57  ;;  %v4036_v10 = vpack.c.bf16 %v2635_v6, %v2634_v58  ;;  %v2618_v61 = vld [vmem:[#allocation8 + $0x340] sm:$0xff]  ;;  %v2637_v4 = vld [vmem:[#allocation8 + $0x3d8] sm:$0xff]  ;;  %v2419_v58 = vld [vmem:[#allocation6 + $0x108] sm:$0xff] }
0x174f   :  { %2706 = vmatprep.mubr.f32.mxu0 %v2371_v9  ;;  %2776 = vmatprep.mubr.f32.mxu1 %v2373_v11  ;;  %v2588_v9 = vld [vmem:[#allocation8 + $0x250] sm:$0xff]  ;;  %v2589_v11 = vld [vmem:[#allocation8 + $0x258] sm:$0xff]  ;;  %v4040_v12 = vpack.c.bf16 %v2637_v4, %v2636_v3 }
0x1750   :  { %2707 = vmatmul.mubr.f32.vlgmr.msra.gmra.mrb[12].mxu0 %v2370_v16  ;;  %2777 = vmatmul.mubr.f32.vlgmr.msra.gmra.mrb[12].mxu1 %v2372_v17  ;;  %v2606_v16 = vld [vmem:[#allocation8 + $0x2e0] sm:$0xff]  ;;  %v2607_v17 = vld [vmem:[#allocation8 + $0x2e8] sm:$0xff]  ;;  %v4010_v24 = vpack.c.bf16 %v2589_v11, %v2588_v9  ;;  %v2404_v6 = vld [vmem:[#allocation6 + $0x90] sm:$0xff] }
0x1751   :  { %3991 = vmatpush3.bf16.msra.mxu0 %v3990_v46  ;;  %4023 = vmatpush3.bf16.msra.mxu1 %v4022_v8  ;;  %v4006_v46 = vpack.c.bf16 %v2587_v7, %v2586_v28  ;;  %v4038_v8 = vpack.c.bf16 %v2619_v62, %v2618_v61  ;;  %v4012_v23 = vpack.c.bf16 %v2607_v17, %v2606_v16  ;;  %v2437_v28 = vld [vmem:[#allocation6 + $0x198] sm:$0xff]  ;;  %v2388_v61 = vld [vmem:[#allocation6 + $0x10] sm:$0xff]  ;;  %v2438_v9 = vld [vmem:[#allocation6 + $0x1a0] sm:$0xff] }
0x1752   :  { %3993 = vmatprep.subr.bf16.mxu0 %v3992_v18  ;;  %4025 = vmatprep.subr.bf16.mxu1 %v4024_v19  ;;  %v2638_v18 = vld [vmem:[#allocation8 + $0x3e0] sm:$0xff]  ;;  %v2639_v19 = vld [vmem:[#allocation8 + $0x3e8] sm:$0xff]  ;;  %v2389_v62 = vld [vmem:[#allocation6 + $0x18] sm:$0xff] }
0x1753   :  { %v4825_v1 = vpop.f32.mrb[10].mxu0  ;;  %v4827_v42 = vpop.f32.mrb[10].mxu1  ;;  %v4044_v32 = vpack.c.bf16 %v2639_v19, %v2638_v18  ;;  %v2420_v3 = vld [vmem:[#allocation6 + $0x110] sm:$0xff]  ;;  %v2421_v4 = vld [vmem:[#allocation6 + $0x118] sm:$0xff]  ;;  %v2439_v11 = vld [vmem:[#allocation6 + $0x1a8] sm:$0xff] }
0x1754   :  { %v2246_v29 = vpop.f32.mrb[11].mxu0  ;;  %v2317_v48 = vpop.f32.mrb[11].mxu1  ;;  %v4092_v17 = vpack.c.bf16 %v2439_v11, %v2438_v9  ;;  %v2422_v18 = vld [vmem:[#allocation6 + $0x120] sm:$0xff]  ;;  %v2423_v19 = vld [vmem:[#allocation6 + $0x128] sm:$0xff] }
0x1755   :  { %v2375_v49 = vadd.f32 %v2353_v33, %v2246_v29  ;;  %v2377_v50 = vadd.f32 %v2361_v34, %v2317_v48  ;;  %3995 = vmatpush3.bf16.msra.mxu0 %v3994_v20  ;;  %4027 = vmatpush3.bf16.msra.mxu1 %v4026_v35  ;;  %v2622_v20 = vld [vmem:[#allocation8 + $0x360] sm:$0xff]  ;;  %v2623_v33 = vld [vmem:[#allocation8 + $0x368] sm:$0xff]  ;;  %v2608_v34 = vld [vmem:[#allocation8 + $0x2f0] sm:$0xff] }
0x1756   :  { %3997 = vmatprep.subr.bf16.mxu0 %v3996_v38  ;;  %4029 = vmatprep.subr.bf16.mxu1 %v4028_v39  ;;  %v2609_v35 = vld [vmem:[#allocation8 + $0x2f8] sm:$0xff]  ;;  %v2348_v38 = vsub.s32 4, %v4806_v54  ;;  %v4014_v39 = vpack.c.bf16 %v2591_v27, %v2590_v26  ;;  %v4046_v40 = vpack.c.bf16 %v2623_v33, %v2622_v20  ;;  %v2624_v29 = vld [vmem:[#allocation8 + $0x370] sm:$0xff]  ;;  %v2357_v54 = vrot.slane %v4813_v55, %v2356_v43 }
0x1757   :  { %2846 = vmatprep.mubr.f32.mxu0 %v2375_v49  ;;  %2916 = vmatprep.mubr.f32.mxu1 %v2377_v50  ;;  %v4016_v44 = vpack.c.bf16 %v2609_v35, %v2608_v34  ;;  %v2625_v48 = vld [vmem:[#allocation8 + $0x378] sm:$0xff]  ;;  %v2403_v49 = vld [vmem:[#allocation6 + $0x88] sm:$0xff]  ;;  %v2434_v50 = vld [vmem:[#allocation6 + $0x180] sm:$0xff]  ;;  %v4098_v43 = vpack.c.bf16 %v2425_v21, %v2424_v36 }
0x1758   :  { %v2349_v52 = vrot.slane %v4813_v55, %v2348_v38  ;;  %v2376_v55 = vadd.f32 %v2357_v54, %v4827_v42  ;;  %v4058_v42 = vpack.c.bf16 %v2389_v62, %v2388_v61  ;;  %v2440_v26 = vld [vmem:[#allocation6 + $0x1b0] sm:$0xff]  ;;  %v2441_v27 = vld [vmem:[#allocation6 + $0x1b8] sm:$0xff]  ;;  %v2410_v38 = vld [vmem:[#allocation6 + $0xc0] sm:$0xff] }
0x1759   :  { %3999 = vmatpush3.bf16.msra.mxu0 %v3998_v47  ;;  %4031 = vmatpush3.bf16.msra.mxu1 %v4030_v51  ;;  %v2402_v47 = vld [vmem:[#allocation6 + $0x80] sm:$0xff]  ;;  %v2435_v51 = vld [vmem:[#allocation6 + $0x188] sm:$0xff]  ;;  %v2392_v20 = vld [vmem:[#allocation6 + $0x30] sm:$0xff]  ;;  %v4096_v35 = vpack.c.bf16 %v2441_v27, %v2440_v26 }
0x175a   :  { %4001 = vmatprep.subr.bf16.mxu0 %v4000_v22  ;;  %4033 = vmatprep.subr.bf16.mxu1 %v4032_v30  ;;  %v4050_v22 = vpack.c.bf16 %v2625_v48, %v2624_v29  ;;  %v2386_v30 = vld [vmem:[#allocation6] sm:$0xff]  ;;  %v4052_v57 = vpack.c.bf16 %v2403_v49, %v2402_v47  ;;  %v4084_v31 = vpack.c.bf16 %v2435_v51, %v2434_v50  ;;  %v2393_v33 = vld [vmem:[#allocation6 + $0x38] sm:$0xff]  ;;  %v2427_v49 = vld [vmem:[#allocation6 + $0x148] sm:$0xff] }
0x175b   :  { %v4054_v7 = vpack.c.bf16 %v2387_v56, %v2386_v30  ;;  %v2374_v63 = vadd.f32 %v2349_v52, %v4825_v1  ;;  %v2381_v1 = vld [vmem:[%s4877_s3 + $0x18] sm:$0xff]  ;;  %v4066_v13 = vpack.c.bf16 %v2393_v33, %v2392_v20  ;;  %v2426_v47 = vld [vmem:[#allocation6 + $0x140] sm:$0xff]  ;;  %v2412_v50 = vld [vmem:[#allocation6 + $0xd0] sm:$0xff] }
0x175c   :  { %v2413_v51 = vld [vmem:[#allocation6 + $0xd8] sm:$0xff]  ;;  %v2444_v52 = vld [vmem:[#allocation6 + $0x1d0] sm:$0xff]  ;;  %v4102_v30 = vpack.c.bf16 %v2427_v49, %v2426_v47  ;;  %v2399_v61 = vld [vmem:[#allocation6 + $0x68] sm:$0xff] }
0x175d   :  { %4003 = vmatpush3.bf16.msra.mxu0 %v4002_v59  ;;  %4035 = vmatpush3.bf16.msra.mxu1 %v4034_v60  ;;  %v2405_v59 = vld [vmem:[#allocation6 + $0x98] sm:$0xff]  ;;  %v2436_v60 = vld [vmem:[#allocation6 + $0x190] sm:$0xff]  ;;  %v4072_v54 = vpack.c.bf16 %v2413_v51, %v2412_v50  ;;  %v2450_v26 = vld [vmem:[#allocation6 + $0x200] sm:$0xff] }
0x175e   :  { %4005 = vmatprep.subr.bf16.mxu0 %v4004_v0  ;;  %4037 = vmatprep.subr.bf16.mxu1 %v4036_v10  ;;  %v4086_v0 = vpack.c.bf16 %v2419_v58, %v2418_v5  ;;  %v4056_v10 = vpack.c.bf16 %v2405_v59, %v2404_v6  ;;  %v4088_v2 = vpack.c.bf16 %v2437_v28, %v2436_v60  ;;  %v2396_v56 = vld [vmem:[#allocation6 + $0x50] sm:$0xff]  ;;  %v2397_v5 = vld [vmem:[#allocation6 + $0x58] sm:$0xff]  ;;  %v2414_v6 = vld [vmem:[#allocation6 + $0xe0] sm:$0xff] }
0x175f   :  { %v2429_v58 = vld [vmem:[#allocation6 + $0x158] sm:$0xff]  ;;  %v2415_v59 = vld [vmem:[#allocation6 + $0xe8] sm:$0xff]  ;;  %v2446_v60 = vld [vmem:[#allocation6 + $0x1e0] sm:$0xff] }
0x1760   :  { %v2447_v28 = vld [vmem:[#allocation6 + $0x1e8] sm:$0xff]  ;;  %v4076_v62 = vpack.c.bf16 %v2415_v59, %v2414_v6  ;;  %v2482_v20 = vld [vmem:[#allocation6 + $0x300] sm:$0xff]  ;;  %v2500_v36 = vld [vmem:[#allocation6 + $0x390] sm:$0xff] }
0x1761   :  { %4007 = vmatpush3.bf16.msra.mxu0 %v4006_v46  ;;  %4039 = vmatpush3.bf16.msra.mxu1 %v4038_v8  ;;  %v2406_v46 = vld [vmem:[#allocation6 + $0xa0] sm:$0xff]  ;;  %v2407_v8 = vld [vmem:[#allocation6 + $0xa8] sm:$0xff]  ;;  %v2501_v21 = vld [vmem:[#allocation6 + $0x398] sm:$0xff] }
0x1762   :  { %4009 = vmatprep.subr.bf16.mxu0 %v4008_v37  ;;  %4041 = vmatprep.subr.bf16.mxu1 %v4040_v12  ;;  %v2379_v37 = vld [vmem:[%s4877_s3 + $0x8] sm:$0xff]  ;;  %v4090_v12 = vpack.c.bf16 %v2421_v4, %v2420_v3  ;;  %v4060_v16 = vpack.c.bf16 %v2407_v8, %v2406_v46  ;;  %v2416_v3 = vld [vmem:[#allocation6 + $0xf0] sm:$0xff]  ;;  %v2417_v4 = vld [vmem:[#allocation6 + $0xf8] sm:$0xff] }
0x1763   :  { %v2448_v46 = vld [vmem:[#allocation6 + $0x1f0] sm:$0xff]  ;;  %v2449_v8 = vld [vmem:[#allocation6 + $0x1f8] sm:$0xff]  ;;  %v2451_v27 = vld [vmem:[#allocation6 + $0x208] sm:$0xff] }
0x1764   :  { %v2483_v33 = vld [vmem:[#allocation6 + $0x308] sm:$0xff]  ;;  %v2470_v47 = vld [vmem:[#allocation6 + $0x2a0] sm:$0xff]  ;;  %v2472_v6 = vld [vmem:[#allocation6 + $0x2b0] sm:$0xff] }
0x1765   :  { %4011 = vmatpush3.bf16.msra.mxu0 %v4010_v24  ;;  %4043 = vmatpush3.bf16.msra.mxu1 %v4042_v25  ;;  %v2408_v24 = vld [vmem:[#allocation6 + $0xb0] sm:$0xff]  ;;  %v2409_v25 = vld [vmem:[#allocation6 + $0xb8] sm:$0xff]  ;;  %v2471_v49 = vld [vmem:[#allocation6 + $0x2a8] sm:$0xff] }
0x1766   :  { %4013 = vmatprep.subr.bf16.mxu0 %v4012_v23  ;;  %4045 = vmatprep.subr.bf16.mxu1 %v4044_v32  ;;  %v4062_v23 = vpack.c.bf16 %v2391_v15, %v2390_v14  ;;  %v4094_v32 = vpack.c.bf16 %v2423_v19, %v2422_v18  ;;  %v4064_v34 = vpack.c.bf16 %v2409_v25, %v2408_v24  ;;  %v2432_v14 = vld [vmem:[#allocation6 + $0x170] sm:$0xff]  ;;  %v2433_v15 = vld [vmem:[#allocation6 + $0x178] sm:$0xff]  ;;  %v2498_v18 = vld [vmem:[#allocation6 + $0x380] sm:$0xff] }
0x1767   :  { %v2499_v19 = vld [vmem:[#allocation6 + $0x388] sm:$0xff]  ;;  %v4114_v25 = vpack.c.bf16 %v2433_v15, %v2432_v14  ;;  %v2502_v50 = vld [vmem:[#allocation6 + $0x3a0] sm:$0xff]  ;;  %v2473_v59 = vld [vmem:[#allocation6 + $0x2b8] sm:$0xff] }
0x1768   :  { %v2503_v51 = vld [vmem:[#allocation6 + $0x3a8] sm:$0xff]  ;;  %v2490_v14 = vld [vmem:[#allocation6 + $0x340] sm:$0xff] }
0x1769   :  { %4015 = vmatpush3.bf16.msra.mxu0 %v4014_v39  ;;  %4047 = vmatpush3.bf16.msra.mxu1 %v4046_v40  ;;  %v2411_v39 = vld [vmem:[#allocation6 + $0xc8] sm:$0xff]  ;;  %v2442_v40 = vld [vmem:[#allocation6 + $0x1c0] sm:$0xff] }
0x176a   :  { %4017 = vmatprep.subr.bf16.mxu0 %v4016_v44  ;;  %4049 = vmatprep.subr.bf16.mxu1 %v4048_v45  ;;  %v2394_v44 = vld [vmem:[#allocation6 + $0x40] sm:$0xff]  ;;  %v2395_v45 = vld [vmem:[#allocation6 + $0x48] sm:$0xff]  ;;  %v4068_v29 = vpack.c.bf16 %v2411_v39, %v2410_v38  ;;  %v4100_v48 = vpack.c.bf16 %v2443_v41, %v2442_v40  ;;  %v4118_v39 = vpack.c.bf16 %v2451_v27, %v2450_v26  ;;  %v2380_v40 = vld [vmem:[%s4877_s3 + $0x10] sm:$0xff] }
0x176b   :  { %v2378_v38 = vld [vmem:[%s4877_s3] sm:$0xff]  ;;  %v4150_v41 = vpack.c.bf16 %v2483_v33, %v2482_v20  ;;  %v2491_v15 = vld [vmem:[#allocation6 + $0x348] sm:$0xff]  ;;  %v2460_v26 = vld [vmem:[#allocation6 + $0x250] sm:$0xff] }
0x176c   :  { %v2461_v27 = vld [vmem:[#allocation6 + $0x258] sm:$0xff]  ;;  %v2492_v20 = vld [vmem:[#allocation6 + $0x350] sm:$0xff] }
0x176d   :  { %4019 = vmatpush3.bf16.msra.mxu0 %v4018_v53  ;;  %4051 = vmatpush3.bf16.msra.mxu1 %v4050_v22  ;;  %v2445_v53 = vld [vmem:[#allocation6 + $0x1d8] sm:$0xff]  ;;  %v4070_v22 = vpack.c.bf16 %v2395_v45, %v2394_v44  ;;  %v4152_v45 = vpack.c.bf16 %v2501_v21, %v2500_v36  ;;  %v2510_v36 = vld [vmem:[#allocation6 + $0x3e0] sm:$0xff]  ;;  %v2511_v21 = vld [vmem:[#allocation6 + $0x3e8] sm:$0xff] }
0x176e   :  { %4053 = vmatprep.subr.bf16.mxu0 %v4052_v57  ;;  %4085 = vmatprep.subr.bf16.mxu1 %v4084_v31  ;;  %v4104_v57 = vpack.c.bf16 %v2445_v53, %v2444_v52  ;;  %v2428_v31 = vld [vmem:[#allocation6 + $0x150] sm:$0xff]  ;;  %v2383_v52 = vld [vmem:[%s4877_s3 + $0x28] sm:$0xff]  ;;  %v2385_v53 = vld [vmem:[%s4877_s3 + $0x38] sm:$0xff] }
0x176f   :  { %v2493_v33 = vld [vmem:[#allocation6 + $0x358] sm:$0xff] }
0x1770   :  { %2847 = vmatmul.mubr.f32.vlgmr.msra.gmra.mrb[14].mxu0 %v2374_v63  ;;  %2917 = vmatmul.mubr.f32.vlgmr.msra.gmra.mrb[14].mxu1 %v2376_v55  ;;  %v4108_v63 = vpack.c.bf16 %v2447_v28, %v2446_v60  ;;  %v2430_v55 = vld [vmem:[#allocation6 + $0x160] sm:$0xff]  ;;  %v2504_v60 = vld [vmem:[#allocation6 + $0x3b0] sm:$0xff]  ;;  %v2505_v28 = vld [vmem:[#allocation6 + $0x3b8] sm:$0xff] }
0x1771   :  { %4055 = vmatpush3.bf16.msra.mxu0 %v4054_v7  ;;  %4087 = vmatpush3.bf16.msra.mxu1 %v4086_v0  ;;  %v4074_v7 = vpack.c.bf16 %v2397_v5, %v2396_v56  ;;  %v4106_v0 = vpack.c.bf16 %v2429_v58, %v2428_v31  ;;  %v2454_v56 = vld [vmem:[#allocation6 + $0x220] sm:$0xff]  ;;  %v2455_v5 = vld [vmem:[#allocation6 + $0x228] sm:$0xff] }
0x1772   :  { %4057 = vmatprep.subr.bf16.mxu0 %v4056_v10  ;;  %4089 = vmatprep.subr.bf16.mxu1 %v4088_v2  ;;  %v2398_v10 = vld [vmem:[#allocation6 + $0x60] sm:$0xff]  ;;  %v2431_v2 = vld [vmem:[#allocation6 + $0x168] sm:$0xff] }
0x1773   :  { %2986 = vmatprep.mubr.f32.mxu0 %v2379_v37  ;;  %3056 = vmatprep.mubr.f32.mxu1 %v2381_v1  ;;  %v4078_v9 = vpack.c.bf16 %v2399_v61, %v2398_v10  ;;  %v4110_v11 = vpack.c.bf16 %v2431_v2, %v2430_v55  ;;  %v2400_v37 = vld [vmem:[#allocation6 + $0x70] sm:$0xff]  ;;  %v2401_v1 = vld [vmem:[#allocation6 + $0x78] sm:$0xff]  ;;  %v2486_v31 = vld [vmem:[#allocation6 + $0x320] sm:$0xff] }
0x1774   :  { %v4082_v24 = vpack.c.bf16 %v2401_v1, %v2400_v37  ;;  %v2487_v58 = vld [vmem:[#allocation6 + $0x328] sm:$0xff]  ;;  %v2456_v10 = vld [vmem:[#allocation6 + $0x230] sm:$0xff]  ;;  %v2457_v61 = vld [vmem:[#allocation6 + $0x238] sm:$0xff] }
0x1775   :  { %4059 = vmatpush3.bf16.msra.mxu0 %v4058_v42  ;;  %4091 = vmatpush3.bf16.msra.mxu1 %v4090_v12  ;;  %v4080_v42 = vpack.c.bf16 %v2417_v4, %v2416_v3  ;;  %v4112_v12 = vpack.c.bf16 %v2449_v8, %v2448_v46  ;;  %v2488_v55 = vld [vmem:[#allocation6 + $0x330] sm:$0xff]  ;;  %v2489_v2 = vld [vmem:[#allocation6 + $0x338] sm:$0xff]  ;;  %v2474_v3 = vld [vmem:[#allocation6 + $0x2c0] sm:$0xff] }
0x1776   :  { %4061 = vmatprep.subr.bf16.mxu0 %v4060_v16  ;;  %4093 = vmatprep.subr.bf16.mxu1 %v4092_v17  ;;  %v2466_v16 = vld [vmem:[#allocation6 + $0x280] sm:$0xff]  ;;  %v2467_v17 = vld [vmem:[#allocation6 + $0x288] sm:$0xff] }
0x1777   :  { %v2475_v4 = vld [vmem:[#allocation6 + $0x2c8] sm:$0xff]  ;;  %v2506_v46 = vld [vmem:[#allocation6 + $0x3c0] sm:$0xff] }
0x1778   :  { %v2507_v8 = vld [vmem:[#allocation6 + $0x3c8] sm:$0xff]  ;;  %v2458_v37 = vld [vmem:[#allocation6 + $0x240] sm:$0xff] }
0x1779   :  { %4063 = vmatpush3.bf16.msra.mxu0 %v4062_v23  ;;  %4095 = vmatpush3.bf16.msra.mxu1 %v4094_v32  ;;  %v4116_v23 = vpack.c.bf16 %v2467_v17, %v2466_v16  ;;  %v4148_v32 = vpack.c.bf16 %v2499_v19, %v2498_v18  ;;  %v2459_v1 = vld [vmem:[#allocation6 + $0x248] sm:$0xff]  ;;  %v2476_v16 = vld [vmem:[#allocation6 + $0x2d0] sm:$0xff]  ;;  %v2477_v17 = vld [vmem:[#allocation6 + $0x2d8] sm:$0xff] }
0x177a   :  { %4065 = vmatprep.subr.bf16.mxu0 %v4064_v34  ;;  %4097 = vmatprep.subr.bf16.mxu1 %v4096_v35  ;;  %v2468_v34 = vld [vmem:[#allocation6 + $0x290] sm:$0xff]  ;;  %v2469_v35 = vld [vmem:[#allocation6 + $0x298] sm:$0xff] }
0x177b   :  { %v4120_v44 = vpack.c.bf16 %v2469_v35, %v2468_v34  ;;  %v2508_v18 = vld [vmem:[#allocation6 + $0x3d0] sm:$0xff]  ;;  %v2509_v19 = vld [vmem:[#allocation6 + $0x3d8] sm:$0xff]  ;;  %v2478_v34 = vld [vmem:[#allocation6 + $0x2e0] sm:$0xff] }
0x177c   :  { %v2479_v35 = vld [vmem:[#allocation6 + $0x2e8] sm:$0xff] }
0x177d   :  { %4067 = vmatpush3.bf16.msra.mxu0 %v4066_v13  ;;  %4099 = vmatpush3.bf16.msra.mxu1 %v4098_v43  ;;  %v2452_v13 = vld [vmem:[#allocation6 + $0x210] sm:$0xff]  ;;  %v2453_v43 = vld [vmem:[#allocation6 + $0x218] sm:$0xff] }
0x177e   :  { %4069 = vmatprep.subr.bf16.mxu0 %v4068_v29  ;;  %4101 = vmatprep.subr.bf16.mxu1 %v4100_v48  ;;  %v2484_v29 = vld [vmem:[#allocation6 + $0x310] sm:$0xff]  ;;  %v2485_v48 = vld [vmem:[#allocation6 + $0x318] sm:$0xff] }
0x1781   :  { %4071 = vmatpush3.bf16.msra.mxu0 %v4070_v22  ;;  %4103 = vmatpush3.bf16.msra.mxu1 %v4102_v30  ;;  %v4122_v22 = vpack.c.bf16 %v2453_v43, %v2452_v13  ;;  %v4154_v30 = vpack.c.bf16 %v2485_v48, %v2484_v29  ;;  %v4140_v13 = vpack.c.bf16 %v2479_v35, %v2478_v34  ;;  %v2480_v29 = vld [vmem:[#allocation6 + $0x2f0] sm:$0xff]  ;;  %v2481_v48 = vld [vmem:[#allocation6 + $0x2f8] sm:$0xff] }
0x1782   :  { %4073 = vmatprep.subr.bf16.mxu0 %v4072_v54  ;;  %4105 = vmatprep.subr.bf16.mxu1 %v4104_v57  ;;  %v4124_v54 = vpack.c.bf16 %v2471_v49, %v2470_v47  ;;  %v4156_v57 = vpack.c.bf16 %v2503_v51, %v2502_v50  ;;  %v4172_v43 = vpack.c.bf16 %v2511_v21, %v2510_v36  ;;  %v2512_v47 = vld [vmem:[#allocation6 + $0x3f0] sm:$0xff]  ;;  %v2513_v49 = vld [vmem:[#allocation6 + $0x3f8] sm:$0xff] }
0x1785   :  { %4075 = vmatpush3.bf16.msra.mxu0 %v4074_v7  ;;  %4107 = vmatpush3.bf16.msra.mxu1 %v4106_v0  ;;  %v4126_v7 = vpack.c.bf16 %v2455_v5, %v2454_v56  ;;  %v4158_v0 = vpack.c.bf16 %v2487_v58, %v2486_v31  ;;  %v2496_v56 = vld [vmem:[#allocation6 + $0x370] sm:$0xff]  ;;  %v2497_v5 = vld [vmem:[#allocation6 + $0x378] sm:$0xff]  ;;  %v2382_v31 = vld [vmem:[%s4877_s3 + $0x20] sm:$0xff] }
0x1786   :  { %4077 = vmatprep.subr.bf16.mxu0 %v4076_v62  ;;  %4109 = vmatprep.subr.bf16.mxu1 %v4108_v63  ;;  %v4128_v62 = vpack.c.bf16 %v2473_v59, %v2472_v6  ;;  %v4160_v63 = vpack.c.bf16 %v2505_v28, %v2504_v60  ;;  %v2384_v58 = vld [vmem:[%s4877_s3 + $0x30] sm:$0xff] }
0x1789   :  { %4079 = vmatpush3.bf16.msra.mxu0 %v4078_v9  ;;  %4111 = vmatpush3.bf16.msra.mxu1 %v4110_v11  ;;  %v4130_v9 = vpack.c.bf16 %v2457_v61, %v2456_v10  ;;  %v4162_v11 = vpack.c.bf16 %v2489_v2, %v2488_v55 }
0x178a   :  { %4081 = vmatprep.subr.bf16.mxu0 %v4080_v42  ;;  %4113 = vmatprep.subr.bf16.mxu1 %v4112_v12  ;;  %v4132_v42 = vpack.c.bf16 %v2475_v4, %v2474_v3  ;;  %v4164_v12 = vpack.c.bf16 %v2507_v8, %v2506_v46 }
0x178d   :  { %4083 = vmatpush3.bf16.msra.mxu0 %v4082_v24  ;;  %4115 = vmatpush3.bf16.msra.mxu1 %v4114_v25  ;;  %v4134_v24 = vpack.c.bf16 %v2459_v1, %v2458_v37  ;;  %v4166_v25 = vpack.c.bf16 %v2491_v15, %v2490_v14 }
0x178e   :  { %4117 = vmatprep.subr.bf16.mxu0 %v4116_v23  ;;  %4149 = vmatprep.subr.bf16.mxu1 %v4148_v32  ;;  %v4136_v23 = vpack.c.bf16 %v2477_v17, %v2476_v16  ;;  %v4168_v32 = vpack.c.bf16 %v2509_v19, %v2508_v18 }
0x1790   :  { %2987 = vmatmul.mubr.f32.vlgmr.msra.gmra.mrb[16].mxu0 %v2378_v38  ;;  %3057 = vmatmul.mubr.f32.vlgmr.msra.gmra.mrb[16].mxu1 %v2380_v40  ;;  %v4138_v38 = vpack.c.bf16 %v2461_v27, %v2460_v26  ;;  %v2462_v40 = vld [vmem:[#allocation6 + $0x260] sm:$0xff] }
0x1791   :  { %4119 = vmatpush3.bf16.msra.mxu0 %v4118_v39  ;;  %4151 = vmatpush3.bf16.msra.mxu1 %v4150_v41  ;;  %v4170_v39 = vpack.c.bf16 %v2493_v33, %v2492_v20  ;;  %v2463_v41 = vld [vmem:[#allocation6 + $0x268] sm:$0xff]  ;;  %v3267_v26 = vld [vmem:[%s4882_s8] ss:$0 sm:$0xff] }
0x1792   :  { %4121 = vmatprep.subr.bf16.mxu0 %v4120_v44  ;;  %4153 = vmatprep.subr.bf16.mxu1 %v4152_v45  ;;  %v2494_v44 = vld [vmem:[#allocation6 + $0x360] sm:$0xff]  ;;  %v2495_v45 = vld [vmem:[#allocation6 + $0x368] sm:$0xff]  ;;  %v4142_v50 = vpack.c.bf16 %v2463_v41, %v2462_v40 }
0x1793   :  { %3126 = vmatprep.mubr.f32.mxu0 %v2383_v52  ;;  %3196 = vmatprep.mubr.f32.mxu1 %v2385_v53  ;;  %v4174_v51 = vpack.c.bf16 %v2495_v45, %v2494_v44  ;;  %v2464_v52 = vld [vmem:[#allocation6 + $0x270] sm:$0xff]  ;;  %v4144_v53 = vpack.c.bf16 %v2481_v48, %v2480_v29 }
0x1795   :  { %4123 = vmatpush3.bf16.msra.mxu0 %v4122_v22  ;;  %4155 = vmatpush3.bf16.msra.mxu1 %v4154_v30  ;;  %v2465_v22 = vld [vmem:[#allocation6 + $0x278] sm:$0xff]  ;;  %v4176_v30 = vpack.c.bf16 %v2513_v49, %v2512_v47 }
0x1796   :  { %4125 = vmatprep.subr.bf16.mxu0 %v4124_v54  ;;  %4157 = vmatprep.subr.bf16.mxu1 %v4156_v57  ;;  %v4146_v54 = vpack.c.bf16 %v2465_v22, %v2464_v52  ;;  %v4178_v57 = vpack.c.bf16 %v2497_v5, %v2496_v56 }
0x1799   :  { %4127 = vmatpush3.bf16.msra.mxu0 %v4126_v7  ;;  %4159 = vmatpush3.bf16.msra.mxu1 %v4158_v0 }
0x179a   :  { %4129 = vmatprep.subr.bf16.mxu0 %v4128_v62  ;;  %4161 = vmatprep.subr.bf16.mxu1 %v4160_v63 }
0x179d   :  { %4131 = vmatpush3.bf16.msra.mxu0 %v4130_v9  ;;  %4163 = vmatpush3.bf16.msra.mxu1 %v4162_v11 }
0x179e   :  { %4133 = vmatprep.subr.bf16.mxu0 %v4132_v42  ;;  %4165 = vmatprep.subr.bf16.mxu1 %v4164_v12 }
0x17a1   :  { %4135 = vmatpush3.bf16.msra.mxu0 %v4134_v24  ;;  %4167 = vmatpush3.bf16.msra.mxu1 %v4166_v25 }
0x17a2   :  { %4137 = vmatprep.subr.bf16.mxu0 %v4136_v23  ;;  %4169 = vmatprep.subr.bf16.mxu1 %v4168_v32 }
0x17a5   :  { %4139 = vmatpush3.bf16.msra.mxu0 %v4138_v38  ;;  %4171 = vmatpush3.bf16.msra.mxu1 %v4170_v39 }
0x17a6   :  { %4141 = vmatprep.subr.bf16.mxu0 %v4140_v13  ;;  %4173 = vmatprep.subr.bf16.mxu1 %v4172_v43 }
0x17a9   :  { %4143 = vmatpush3.bf16.msra.mxu0 %v4142_v50  ;;  %4175 = vmatpush3.bf16.msra.mxu1 %v4174_v51 }
0x17aa   :  { %4145 = vmatprep.subr.bf16.mxu0 %v4144_v53  ;;  %4177 = vmatprep.subr.bf16.mxu1 %v4176_v30 }
0x17ad   :  { %4147 = vmatpush3.bf16.msra.mxu0 %v4146_v54  ;;  %4179 = vmatpush3.bf16.msra.mxu1 %v4178_v57 }
0x17b0   :  { %3127 = vmatmul.mubr.f32.vlgmr.msra.gmra.mrb[18].mxu0 %v2382_v31  ;;  %3197 = vmatmul.mubr.f32.vlgmr.msra.gmra.mrb[18].mxu1 %v2384_v58 }
0x1823   :  { %v3356_v6 = vpop.f32.mrb[12].mxu0  ;;  %v3391_v59 = vpop.f32.mrb[12].mxu1 }
0x1824   :  { %v3357_v60 = vpop.f32.mrb[13].mxu0  ;;  %v3392_v28 = vpop.f32.mrb[13].mxu1 }
0x1825   :  { %v3358_v7 = vadd.f32 %v3357_v60, %v3356_v6  ;;  %v3393_v0 = vadd.f32 %v3392_v28, %v3391_v59 }
0x1827   :  { %v2779_v10 = vadd.f32 %v3393_v0, %v3358_v7 }
0x1843   :  { %v3426_v61 = vpop.f32.mrb[14].mxu0  ;;  %v3461_v62 = vpop.f32.mrb[14].mxu1 }
0x1844   :  { %v3427_v63 = vpop.f32.mrb[15].mxu0  ;;  %v3462_v55 = vpop.f32.mrb[15].mxu1 }
0x1845   :  { %v3428_v2 = vadd.f32 %v3427_v63, %v3426_v61  ;;  %v3463_v3 = vadd.f32 %v3462_v55, %v3461_v62 }
0x1847   :  { %v2849_v4 = vadd.f32 %v3428_v2, %v2779_v10 }
0x1849   :  { %v2919_v46 = vadd.f32 %v3463_v3, %v2849_v4 }
0x1863   :  { %v3496_v8 = vpop.f32.mrb[16].mxu0  ;;  %v3531_v9 = vpop.f32.mrb[16].mxu1 }
0x1864   :  { %v3497_v11 = vpop.f32.mrb[17].mxu0  ;;  %v3532_v37 = vpop.f32.mrb[17].mxu1 }
0x1865   :  { %v3498_v1 = vadd.f32 %v3497_v11, %v3496_v8  ;;  %v3533_v42 = vadd.f32 %v3532_v37, %v3531_v9 }
0x1867   :  { %v2989_v12 = vadd.f32 %v3498_v1, %v2919_v46 }
0x1869   :  { %v3059_v14 = vadd.f32 %v3533_v42, %v2989_v12 }
0x1883   :  { %v3566_v15 = vpop.f32.mrb[18].mxu0  ;;  %v3601_v16 = vpop.f32.mrb[18].mxu1 }
0x1884   :  { %v3567_v17 = vpop.f32.mrb[19].mxu0  ;;  %v3602_v18 = vpop.f32.mrb[19].mxu1 }
0x1885   :  { %v3568_v19 = vadd.f32 %v3567_v17, %v3566_v15  ;;  %v3603_v24 = vadd.f32 %v3602_v18, %v3601_v16 }
0x1887   :  { %v3129_v25 = vadd.f32 %v3568_v19, %v3059_v14 }
0x1889   :  { %v3199_v27 = vadd.f32 %v3603_v24, %v3129_v25 }
0x188b   :  { %v3209_v23 = vadd.f32 %v3267_v26, %v3199_v27 }
0x188d   :  { %3210 = vst [vmem:[#allocation9] sm:$0xff] %v3209_v23 }
0x188e   :  { %4358 = shalt.err (!%p4355_p0)
}
0x188f   :  { %s4359_s19 = scalar_lea.hbm %s4883_s9, 128 }
0x1890   :  { %p4360_p1 = scmp.ne.s32.totalorder %s4883_s9, %s4359_s19  ;;  %p4363_p2 = scmp.lt.u32.totalorder %s4359_s19, %s4883_s9 }
0x1892   :  { %p4365_p3 = pnand %p4363_p2, %p4360_p1 }
0x1894   :  { %4368 = shalt.err (!%p4365_p3)
}
0x1895   :  { %3220 = dma.vmem_to_hbm [thread:$0]  %s3218_s24, 128, %s4883_s9, [#allocation5]  }
0x1896   :  { %4373 = dma.done.wait [#allocation5], 128  }
0x1897   :  { %4374 = vsyncadd [#allocation5], 4294967168 }
0x1898   :  { %3224 = vsyncpa [#allocation4], 1 }
0x1899   :  { %3225 = vsyncpa [#allocation7], 1 }
0x189a   :  { %3226 = vsyncpa [#allocation5], 1 }

</bundles_post_ra>
